<compile_context>
chip_gen: v7x
topology: tpu7x:2x2x1
jax: 0.10.0
libtpu: 0.0.40
codegen_flags: <defaults>
</compile_context>

<pallas_src>
import functools

import numpy as np
import jax
import jax.numpy as jnp
from jax import lax
from jax.experimental import pallas as pl
from jax.experimental.pallas import tpu as pltpu


# ------------------------------- Pallas kernel ------------------------------ #

def _head_kernel(x_ref, mask_ref, slab_ref, o_ref, rc_ref, *,
                 W, off, reg_mid, cls_mid, n_out_pad):
    """Fused YOLOv10 single-scale head over one lane-chunk (whole images).

    x_ref:    (Cin, N)        input, batch*spatial flattened on lanes
    mask_ref: (9, 8, N)       sublane-replicated 0/1 SAME-padding mask per tap
    slab_ref: (R, 16)         all weights/biases/dw-scalars, 8-row aligned blocks
    o_ref:    (n_out_pad, N)  padded [reg; cls] output
    rc_ref:   (reg_mid+cls_mid, N) VMEM scratch for the fused output matmul
    """
    N = x_ref.shape[-1]
    offs = tuple((t // 3 - 1) * W + (t % 3 - 1) for t in range(9))

    def tap_mask(t, C):
        m = mask_ref[t]                               # (8, N), 0/1
        if C == m.shape[0]:
            return m
        return m[:C, :] if C < m.shape[0] else m[:1, :]

    def shift_tap(v, t):
        # v spatially shifted by tap t (SAME zero padding via mask), (C, N).
        # Image boundaries coincide with roll-wrap boundaries, so the circular
        # roll over the whole lane span stays exact.
        o = offs[t]
        if o == 0:
            return v
        rolled = pltpu.roll(v, shift=(-o) % N, axis=1)   # XLU lane rotate
        return rolled * tap_mask(t, v.shape[0])

    def tree_sum(terms):
        # pairwise add tree: lets VALU adds co-issue against XLU rolls
        while len(terms) > 1:
            nxt = [terms[i] + terms[i + 1] for i in range(0, len(terms) - 1, 2)]
            if len(terms) % 2:
                nxt.append(terms[-1])
            terms = nxt
        return terms[0]

    def silu(v):
        # sigmoid = 1 / (1 + exp(-v)); exp + approx-reciprocal both ride the EUP
        return v * pl.reciprocal(1.0 + jnp.exp(-v), approx=True)

    def bias(name, C):
        r = off[name]
        return slab_ref[r:r + C, 0:1]

    def matw(name, rows, cols):
        r = off[name]
        return slab_ref[r:r + rows, 0:cols]

    def dense3x3(v, wname, bname, cout):
        # ONE MXU matmul: (9*Cout, Cin) @ (Cin, N); then shift-and-add the 9
        # aligned Cout-row slices (shift-after-matmul, exact by linearity).
        cin = v.shape[0]
        z = jnp.dot(matw(wname, 9 * cout, cin), v,
                    preferred_element_type=jnp.float32)
        taps = [shift_tap(z[t * cout:(t + 1) * cout, :], t) for t in range(9)]
        return tree_sum(taps) + bias(bname, cout)

    def dw3x3(v, wname, bname):
        # Depthwise 3x3 as VPU broadcast MACs over the 9 taps.
        C = v.shape[0]
        base = off[wname]
        taps = [slab_ref[base + 8 * t: base + 8 * t + C, 0:1] * shift_tap(v, t)
                for t in range(9)]
        return tree_sum(taps) + bias(bname, C)

    def pw(v, wname, bname, cout):
        cin = v.shape[0]
        return jnp.dot(matw(wname, cout, cin), v,
                       preferred_element_type=jnp.float32) + bias(bname, cout)

    x = x_ref[...].astype(jnp.float32)                # cast on-resident tile

    # --- regression branch: Conv3x3+SiLU -> Conv3x3+SiLU ---
    r = silu(dense3x3(x, "reg_c1_w", "reg_c1_b", reg_mid))
    r = silu(dense3x3(r, "reg_c2_w", "reg_c2_b", reg_mid))

    # --- classification branch: DW -> PW -> DW -> PW (all +SiLU) ---
    c = silu(dw3x3(x, "dw1_w", "dw1_b"))
    c = silu(pw(c, "pw1_w", "pw1_b", cls_mid))
    c = silu(dw3x3(c, "dw2_w", "dw2_b"))
    c = silu(pw(c, "pw2_w", "pw2_b", cls_mid))

    # --- fused epilogue: both final 1x1 convs as ONE block-diagonal matmul
    # on the stacked [r; c] activation, ONE contiguous lane-dense store.
    rc_ref[:reg_mid, :] = r
    rc_ref[reg_mid:, :] = c
    w_out = matw("out_w", n_out_pad, reg_mid + cls_mid)
    o_ref[...] = (jnp.dot(w_out, rc_ref[...],
                          preferred_element_type=jnp.float32)
                  + bias("out_b", n_out_pad))


# ------------------------------ host-side packing --------------------------- #

def _boundary_masks(H, W, reps):
    """(9, 8, reps*H*W) f32 0/1 masks: SAME zero padding per 3x3 tap,
    tiled over `reps` images and replicated across 8 sublanes."""
    yy = np.arange(H)[:, None]
    xx = np.arange(W)[None, :]
    m = np.empty((9, H * W), np.float32)
    for t in range(9):
        dy, dx = t // 3 - 1, t % 3 - 1
        valid = ((yy + dy >= 0) & (yy + dy < H) &
                 (xx + dx >= 0) & (xx + dx < W))
        m[t] = valid.reshape(-1).astype(np.float32)
    m = np.tile(m, (1, reps))
    return np.ascontiguousarray(np.broadcast_to(m[:, None, :],
                                                (9, 8, reps * H * W)))


def _pack_slab(params, in_ch, reg_mid, cls_mid, n_reg, n_cls):
    """Pack every weight/bias/dw-scalar into one (R, 16) f32 slab.
    Every block starts on an 8-row boundary; data columns start at 0."""
    n_out = n_reg + n_cls
    n_out_pad = ((n_out + 7) // 8) * 8
    cols = max(8, in_ch, reg_mid, cls_mid, reg_mid + cls_mid)

    blocks, off = [], {}
    row = 0

    def add(name, a):
        nonlocal row
        a = np.asarray(a, np.float32)
        if a.ndim == 1:
            a = a[:, None]
        r, c = a.shape
        rp = ((r + 7) // 8) * 8
        buf = np.zeros((rp, cols), np.float32)
        buf[:r, :c] = a
        off[name] = row
        blocks.append(buf)
        row += rp

    def dw_block(w):                                   # (9, C, 1) -> (72, 1)
        w = np.asarray(w, np.float32)
        C = w.shape[1]
        buf = np.zeros((9 * 8, 1), np.float32)
        for t in range(9):
            buf[8 * t:8 * t + C, 0] = w[t, :, 0]
        return buf

    # matmul weights
    add("reg_c1_w", params["reg_c1_w"])                # (9*reg_mid, in_ch)
    add("reg_c2_w", params["reg_c2_w"])                # (9*reg_mid, reg_mid)
    add("pw1_w", params["cls_pw1_w"])                  # (cls_mid, in_ch)
    add("pw2_w", params["cls_pw2_w"])                  # (cls_mid, cls_mid)
    # fused block-diagonal output 1x1: rows [reg | cls], padded to n_out_pad
    w_out = np.zeros((n_out_pad, reg_mid + cls_mid), np.float32)
    w_out[:n_reg, :reg_mid] = np.asarray(params["reg_out_w"], np.float32)
    w_out[n_reg:n_out, reg_mid:] = np.asarray(params["cls_out_w"], np.float32)
    add("out_w", w_out)
    # biases (column vectors, data in column 0)
    add("reg_c1_b", params["reg_c1_b"])
    add("reg_c2_b", params["reg_c2_b"])
    add("dw1_b", params["cls_dw1_b"])
    add("pw1_b", params["cls_pw1_b"])
    add("dw2_b", params["cls_dw2_b"])
    add("pw2_b", params["cls_pw2_b"])
    b_out = np.zeros((n_out_pad, 1), np.float32)
    b_out[:n_reg, 0] = np.asarray(params["reg_out_b"], np.float32)[:, 0]
    b_out[n_reg:n_out, 0] = np.asarray(params["cls_out_b"], np.float32)[:, 0]
    add("out_b", b_out)
    # depthwise 3x3 per-tap scalars, one 8-row block per tap
    add("dw1_w", dw_block(params["cls_dw1_w"]))
    add("dw2_w", dw_block(params["cls_dw2_w"]))

    return np.concatenate(blocks, axis=0), off, n_out_pad


def _pick_num_chunks(batch, hw):
    """2-way lane split only on dual-TensorCore chips (v7x); 1 step elsewhere."""
    try:
        kind = jax.devices()[0].device_kind.lower()
    except Exception:
        kind = ""
    dual_core = "7" in kind            # v7x has 2 TensorCores per chip
    if dual_core and batch >= 2 and batch % 2 == 0 and (batch * hw // 2) % 128 == 0:
        return 2
    return 1


# --------------------------------- wrapper ---------------------------------- #

def make_yolo_v10_head(params, in_ch, cls_mid, reg_mid, num_classes,
                       num_reg_preds):
    """Packs parameters once (host-side) and returns a jitted NCHW forward."""
    n_reg = 4 * num_reg_preds
    n_cls = num_classes
    n_out = n_reg + n_cls
    slab_np, off, n_out_pad = _pack_slab(params, in_ch, reg_mid, cls_mid,
                                         n_reg, n_cls)
    slab = jnp.asarray(slab_np)

    @jax.jit
    def forward(P):                                    # P: (B, Cin, H, W)
        B, C, H, W = P.shape
        HW = H * W
        # layout plumbing: batch*spatial onto the lane axis (tiny XLA transpose)
        x2d = jnp.transpose(P, (1, 0, 2, 3)).reshape(C, B * HW)

        num_chunks = _pick_num_chunks(B, HW)
        chunk_n = (B * HW) // num_chunks
        mask = jnp.asarray(_boundary_masks(H, W, B // num_chunks))

        kernel = functools.partial(_head_kernel, W=W, off=off,
                                   reg_mid=reg_mid, cls_mid=cls_mid,
                                   n_out_pad=n_out_pad)

        out_flat = pl.pallas_call(
            kernel,
            out_shape=jax.ShapeDtypeStruct((n_out_pad, B * HW), jnp.float32),
            grid=(num_chunks,),
            in_specs=[
                pl.BlockSpec((C, chunk_n), lambda g: (0, g)),
                pl.BlockSpec(mask.shape, lambda g: (0, 0, 0)),   # never re-DMA'd
                pl.BlockSpec(slab.shape, lambda g: (0, 0)),      # never re-DMA'd
            ],
            out_specs=pl.BlockSpec((n_out_pad, chunk_n), lambda g: (0, g)),
            scratch_shapes=[pltpu.VMEM((reg_mid + cls_mid, chunk_n),
                                       jnp.float32)],
            compiler_params=pltpu.CompilerParams(
                dimension_semantics=("parallel",)),
        )(x2d, mask, slab)

        out = out_flat[:n_out].reshape(n_out, B, H, W)
        return jnp.transpose(out, (1, 0, 2, 3))        # (B, n_out, H, W)

    return forward


# ------------------------- parameters (BN pre-folded) ----------------------- #

def init_params(key, in_ch, cls_mid, reg_mid, num_classes, num_reg_preds):
    """Deterministic synthetic parameters, stored in kernel-native layout."""
    num_reg_out = 4 * num_reg_preds
    ks = jax.random.split(key, 16)

    def rnd(k, shape, scale=0.2):
        return (scale * jax.random.normal(k, shape)).astype(jnp.float32)

    return {
        # regression head: dense 3x3 taps stacked as (9*Cout, Cin)
        "reg_c1_w": rnd(ks[0], (9 * reg_mid, in_ch)),
        "reg_c1_b": rnd(ks[1], (reg_mid, 1)),
        "reg_c2_w": rnd(ks[2], (9 * reg_mid, reg_mid)),
        "reg_c2_b": rnd(ks[3], (reg_mid, 1)),
        "reg_out_w": rnd(ks[4], (num_reg_out, reg_mid)),
        "reg_out_b": rnd(ks[5], (num_reg_out, 1)),
        # classification head
        "cls_dw1_w": rnd(ks[6], (9, in_ch, 1)),
        "cls_dw1_b": rnd(ks[7], (in_ch, 1)),
        "cls_pw1_w": rnd(ks[8], (cls_mid, in_ch)),
        "cls_pw1_b": rnd(ks[9], (cls_mid, 1)),
        "cls_dw2_w": rnd(ks[10], (9, cls_mid, 1)),
        "cls_dw2_b": rnd(ks[11], (cls_mid, 1)),
        "cls_pw2_w": rnd(ks[12], (cls_mid, cls_mid)),
        "cls_pw2_b": rnd(ks[13], (cls_mid, 1)),
        "cls_out_w": rnd(ks[14], (num_classes, cls_mid)),
        "cls_out_b": rnd(ks[15], (num_classes, 1)),
    }


# ----------------------------- pure-JAX reference --------------------------- #

def _silu(x):
    return x * jax.nn.sigmoid(x)


def _ref_dense3x3(x, w_stacked, b):
    cout = b.shape[0]
    cin = w_stacked.shape[1]
    w = w_stacked.reshape(3, 3, cout, cin).transpose(2, 3, 0, 1)   # OIHW
    y = lax.conv_general_dilated(
        x, w, window_strides=(1, 1), padding="SAME",
        dimension_numbers=("NCHW", "OIHW", "NCHW"))
    return y + b.reshape(1, cout, 1, 1)


def _ref_dw3x3(x, w_dw, b):
    C = b.shape[0]
    w = w_dw.reshape(3, 3, C).transpose(2, 0, 1).reshape(C, 1, 3, 3)
    y = lax.conv_general_dilated(
        x, w, window_strides=(1, 1), padding="SAME",
        dimension_numbers=("NCHW", "OIHW", "NCHW"),
        feature_group_count=C)
    return y + b.reshape(1, C, 1, 1)


def _ref_pw(x, w, b):
    return jnp.einsum("oc,bchw->bohw", w, x) + b.reshape(1, -1, 1, 1)


def reference_forward(P_nchw, p):
    x = P_nchw.astype(jnp.float32)
    r = _silu(_ref_dense3x3(x, p["reg_c1_w"], p["reg_c1_b"]))
    r = _silu(_ref_dense3x3(r, p["reg_c2_w"], p["reg_c2_b"]))
    reg = _ref_pw(r, p["reg_out_w"], p["reg_out_b"])
    c = _silu(_ref_dw3x3(x, p["cls_dw1_w"], p["cls_dw1_b"]))
    c = _silu(_ref_pw(c, p["cls_pw1_w"], p["cls_pw1_b"]))
    c = _silu(_ref_dw3x3(c, p["cls_dw2_w"], p["cls_dw2_b"]))
    c = _silu(_ref_pw(c, p["cls_pw2_w"], p["cls_pw2_b"]))
    cls = _ref_pw(c, p["cls_out_w"], p["cls_out_b"])
    return jnp.concatenate([reg, cls], axis=1)


# ----------------------------------- main ------------------------------------ #

if __name__ == "__main__":
    # Module hyper-parameters (small, consistent with the PyTorch __init__):
    in_channels, cls_mid, reg_mid = 4, 8, 8
    num_classes, num_reg_preds, stride = 6, 1, 8   # stride unused in forward
    B, H, W = 2, 16, 16

    key = jax.random.PRNGKey(0)
    k_x, k_p = jax.random.split(key)
    P = jax.random.normal(k_x, (B, in_channels, H, W), dtype=jnp.float32)  # NCHW
    params = init_params(k_p, in_channels, cls_mid, reg_mid,
                         num_classes, num_reg_preds)

    fwd = make_yolo_v10_head(params, in_channels, cls_mid, reg_mid,
                             num_classes, num_reg_preds)
    out = jax.block_until_ready(fwd(P))

    expected_shape = (B, 4 * num_reg_preds + num_classes, H, W)
    assert out.shape == expected_shape, (out.shape, expected_shape)

    ref = reference_forward(P, params)
    # Slightly looser tolerance than pure-f32: SiLU uses the EUP approximate
    # reciprocal (~2^-12 rel error per sigmoid, chained over <=4 layers).
    assert jnp.allclose(out, ref, rtol=5e-3, atol=5e-3), \
        float(jnp.max(jnp.abs(out - ref)))

    # TODO(synk): bias_init() mutates the final-layer biases only; it is not part
    # of forward() and is therefore not modeled here.
    print("KERNEL_OK")
</pallas_src>

<mosaic_0001>
module attributes {stable_mosaic.version = 11 : i64} {
  func.func @_head_kernel(%arg0: i32, %arg1: memref<4x512xf32, #tpu.memory_space<vmem>>, %arg2: memref<9x8x512xf32, #tpu.memory_space<vmem>>, %arg3: memref<384x16xf32, #tpu.memory_space<vmem>>, %arg4: memref<16x512xf32, #tpu.memory_space<vmem>>, %arg5: memref<16x512xf32, #tpu.memory_space<vmem>>) attributes {dimension_semantics = [#tpu.dimension_semantics<parallel>], iteration_bounds = array<i64: 1>, scalar_prefetch = 0 : i64, scratch_operands = 1 : i64, tpu.core_type = #tpu.core_type<tc>, window_params = [{transform_indices = @transform_0, window_bounds = array<i64: 4, 512>}, {pipeline_mode = #tpu.pipeline_mode<synchronous>, transform_indices = @transform_1, window_bounds = array<i64: 9, 8, 512>}, {pipeline_mode = #tpu.pipeline_mode<synchronous>, transform_indices = @transform_2, window_bounds = array<i64: 384, 16>}, {transform_indices = @transform_3, window_bounds = array<i64: 16, 512>}]} {
    %c0 = arith.constant 0 : index
    %c0_0 = arith.constant 0 : index
    %0 = vector.load %arg1[%c0, %c0_0] : memref<4x512xf32, #tpu.memory_space<vmem>>, vector<4x512xf32>
    %c0_1 = arith.constant 0 : index
    %c0_2 = arith.constant 0 : index
    %1 = vector.load %arg3[%c0_1, %c0_2] : memref<384x16xf32, #tpu.memory_space<vmem>>, vector<72x4xf32>
    %cst = arith.constant dense<0.000000e+00> : vector<72x512xf32>
    %2 = tpu.matmul %1, %0, %cst {dimension_numbers = #tpu.dot_dimension_numbers<[1], [0], [0], [1], [0, 0, 1, 1], [], []>} : vector<72x4xf32>, vector<4x512xf32>, vector<72x512xf32> -> vector<72x512xf32>
    %3 = vector.extract_strided_slice %2 {offsets = [0, 0], sizes = [8, 512], strides = [1, 1]} : vector<72x512xf32> to vector<8x512xf32>
    %c17_i32 = arith.constant 17 : i32
    %4 = tpu.dynamic_rotate %3 by %c17_i32 dim 1 : vector<8x512xf32>, i32 -> vector<8x512xf32>
    %c0_3 = arith.constant 0 : index
    %c0_4 = arith.constant 0 : index
    %c0_5 = arith.constant 0 : index
    %5 = vector.load %arg2[%c0_3, %c0_4, %c0_5] : memref<9x8x512xf32, #tpu.memory_space<vmem>>, vector<1x8x512xf32>
    %6 = vector.shape_cast %5 : vector<1x8x512xf32> to vector<8x512xf32>
    %7 = arith.mulf %4, %6 : vector<8x512xf32>
    %8 = vector.extract_strided_slice %2 {offsets = [8, 0], sizes = [8, 512], strides = [1, 1]} : vector<72x512xf32> to vector<8x512xf32>
    %c16_i32 = arith.constant 16 : i32
    %9 = tpu.dynamic_rotate %8 by %c16_i32 dim 1 : vector<8x512xf32>, i32 -> vector<8x512xf32>
    %c1 = arith.constant 1 : index
    %c0_6 = arith.constant 0 : index
    %c0_7 = arith.constant 0 : index
    %10 = vector.load %arg2[%c1, %c0_6, %c0_7] : memref<9x8x512xf32, #tpu.memory_space<vmem>>, vector<1x8x512xf32>
    %11 = vector.shape_cast %10 : vector<1x8x512xf32> to vector<8x512xf32>
    %12 = arith.mulf %9, %11 : vector<8x512xf32>
    %13 = vector.extract_strided_slice %2 {offsets = [16, 0], sizes = [8, 512], strides = [1, 1]} : vector<72x512xf32> to vector<8x512xf32>
    %c15_i32 = arith.constant 15 : i32
    %14 = tpu.dynamic_rotate %13 by %c15_i32 dim 1 : vector<8x512xf32>, i32 -> vector<8x512xf32>
    %c2 = arith.constant 2 : index
    %c0_8 = arith.constant 0 : index
    %c0_9 = arith.constant 0 : index
    %15 = vector.load %arg2[%c2, %c0_8, %c0_9] : memref<9x8x512xf32, #tpu.memory_space<vmem>>, vector<1x8x512xf32>
    %16 = vector.shape_cast %15 : vector<1x8x512xf32> to vector<8x512xf32>
    %17 = arith.mulf %14, %16 : vector<8x512xf32>
    %18 = vector.extract_strided_slice %2 {offsets = [24, 0], sizes = [8, 512], strides = [1, 1]} : vector<72x512xf32> to vector<8x512xf32>
    %c1_i32 = arith.constant 1 : i32
    %19 = tpu.dynamic_rotate %18 by %c1_i32 dim 1 : vector<8x512xf32>, i32 -> vector<8x512xf32>
    %c3 = arith.constant 3 : index
    %c0_10 = arith.constant 0 : index
    %c0_11 = arith.constant 0 : index
    %20 = vector.load %arg2[%c3, %c0_10, %c0_11] : memref<9x8x512xf32, #tpu.memory_space<vmem>>, vector<1x8x512xf32>
    %21 = vector.shape_cast %20 : vector<1x8x512xf32> to vector<8x512xf32>
    %22 = arith.mulf %19, %21 : vector<8x512xf32>
    %23 = vector.extract_strided_slice %2 {offsets = [32, 0], sizes = [8, 512], strides = [1, 1]} : vector<72x512xf32> to vector<8x512xf32>
    %24 = vector.extract_strided_slice %2 {offsets = [40, 0], sizes = [8, 512], strides = [1, 1]} : vector<72x512xf32> to vector<8x512xf32>
    %c511_i32 = arith.constant 511 : i32
    %25 = tpu.dynamic_rotate %24 by %c511_i32 dim 1 : vector<8x512xf32>, i32 -> vector<8x512xf32>
    %c5 = arith.constant 5 : index
    %c0_12 = arith.constant 0 : index
    %c0_13 = arith.constant 0 : index
    %26 = vector.load %arg2[%c5, %c0_12, %c0_13] : memref<9x8x512xf32, #tpu.memory_space<vmem>>, vector<1x8x512xf32>
    %27 = vector.shape_cast %26 : vector<1x8x512xf32> to vector<8x512xf32>
    %28 = arith.mulf %25, %27 : vector<8x512xf32>
    %29 = vector.extract_strided_slice %2 {offsets = [48, 0], sizes = [8, 512], strides = [1, 1]} : vector<72x512xf32> to vector<8x512xf32>
    %c497_i32 = arith.constant 497 : i32
    %30 = tpu.dynamic_rotate %29 by %c497_i32 dim 1 : vector<8x512xf32>, i32 -> vector<8x512xf32>
    %c6 = arith.constant 6 : index
    %c0_14 = arith.constant 0 : index
    %c0_15 = arith.constant 0 : index
    %31 = vector.load %arg2[%c6, %c0_14, %c0_15] : memref<9x8x512xf32, #tpu.memory_space<vmem>>, vector<1x8x512xf32>
    %32 = vector.shape_cast %31 : vector<1x8x512xf32> to vector<8x512xf32>
    %33 = arith.mulf %30, %32 : vector<8x512xf32>
    %34 = vector.extract_strided_slice %2 {offsets = [56, 0], sizes = [8, 512], strides = [1, 1]} : vector<72x512xf32> to vector<8x512xf32>
    %c496_i32 = arith.constant 496 : i32
    %35 = tpu.dynamic_rotate %34 by %c496_i32 dim 1 : vector<8x512xf32>, i32 -> vector<8x512xf32>
    %c7 = arith.constant 7 : index
    %c0_16 = arith.constant 0 : index
    %c0_17 = arith.constant 0 : index
    %36 = vector.load %arg2[%c7, %c0_16, %c0_17] : memref<9x8x512xf32, #tpu.memory_space<vmem>>, vector<1x8x512xf32>
    %37 = vector.shape_cast %36 : vector<1x8x512xf32> to vector<8x512xf32>
    %38 = arith.mulf %35, %37 : vector<8x512xf32>
    %39 = vector.extract_strided_slice %2 {offsets = [64, 0], sizes = [8, 512], strides = [1, 1]} : vector<72x512xf32> to vector<8x512xf32>
    %c495_i32 = arith.constant 495 : i32
    %40 = tpu.dynamic_rotate %39 by %c495_i32 dim 1 : vector<8x512xf32>, i32 -> vector<8x512xf32>
    %c8 = arith.constant 8 : index
    %c0_18 = arith.constant 0 : index
    %c0_19 = arith.constant 0 : index
    %41 = vector.load %arg2[%c8, %c0_18, %c0_19] : memref<9x8x512xf32, #tpu.memory_space<vmem>>, vector<1x8x512xf32>
    %42 = vector.shape_cast %41 : vector<1x8x512xf32> to vector<8x512xf32>
    %43 = arith.mulf %40, %42 : vector<8x512xf32>
    %44 = arith.addf %7, %12 : vector<8x512xf32>
    %45 = arith.addf %17, %22 : vector<8x512xf32>
    %46 = arith.addf %23, %28 : vector<8x512xf32>
    %47 = arith.addf %33, %38 : vector<8x512xf32>
    %48 = arith.addf %44, %45 : vector<8x512xf32>
    %49 = arith.addf %46, %47 : vector<8x512xf32>
    %50 = arith.addf %48, %49 : vector<8x512xf32>
    %51 = arith.addf %50, %43 : vector<8x512xf32>
    %c176 = arith.constant 176 : index
    %c0_20 = arith.constant 0 : index
    %52 = vector.load %arg3[%c176, %c0_20] : memref<384x16xf32, #tpu.memory_space<vmem>>, vector<8x1xf32>
    %53 = vector.broadcast %52 : vector<8x1xf32> to vector<8x512xf32>
    %54 = arith.addf %51, %53 : vector<8x512xf32>
    %cst_21 = arith.constant 0.000000e+00 : f32
    %55 = vector.broadcast %cst_21 : f32 to vector<8x512xf32>
    %56 = arith.subf %55, %54 : vector<8x512xf32>
    %57 = math.exp %56 : vector<8x512xf32>
    %cst_22 = arith.constant 1.000000e+00 : f32
    %58 = vector.broadcast %cst_22 : f32 to vector<8x512xf32>
    %59 = arith.addf %58, %57 : vector<8x512xf32>
    %60 = tpu.reciprocal %59 {approx = true} : vector<8x512xf32> -> vector<8x512xf32>
    %61 = arith.mulf %54, %60 : vector<8x512xf32>
    %c72 = arith.constant 72 : index
    %c0_23 = arith.constant 0 : index
    %62 = vector.load %arg3[%c72, %c0_23] : memref<384x16xf32, #tpu.memory_space<vmem>>, vector<72x8xf32>
    %cst_24 = arith.constant dense<0.000000e+00> : vector<72x512xf32>
    %63 = tpu.matmul %62, %61, %cst_24 {dimension_numbers = #tpu.dot_dimension_numbers<[1], [0], [0], [1], [0, 0, 1, 1], [], []>} : vector<72x8xf32>, vector<8x512xf32>, vector<72x512xf32> -> vector<72x512xf32>
    %64 = vector.extract_strided_slice %63 {offsets = [0, 0], sizes = [8, 512], strides = [1, 1]} : vector<72x512xf32> to vector<8x512xf32>
    %c17_i32_25 = arith.constant 17 : i32
    %65 = tpu.dynamic_rotate %64 by %c17_i32_25 dim 1 : vector<8x512xf32>, i32 -> vector<8x512xf32>
    %c0_26 = arith.constant 0 : index
    %c0_27 = arith.constant 0 : index
    %c0_28 = arith.constant 0 : index
    %66 = vector.load %arg2[%c0_26, %c0_27, %c0_28] : memref<9x8x512xf32, #tpu.memory_space<vmem>>, vector<1x8x512xf32>
    %67 = vector.shape_cast %66 : vector<1x8x512xf32> to vector<8x512xf32>
    %68 = arith.mulf %65, %67 : vector<8x512xf32>
    %69 = vector.extract_strided_slice %63 {offsets = [8, 0], sizes = [8, 512], strides = [1, 1]} : vector<72x512xf32> to vector<8x512xf32>
    %c16_i32_29 = arith.constant 16 : i32
    %70 = tpu.dynamic_rotate %69 by %c16_i32_29 dim 1 : vector<8x512xf32>, i32 -> vector<8x512xf32>
    %c1_30 = arith.constant 1 : index
    %c0_31 = arith.constant 0 : index
    %c0_32 = arith.constant 0 : index
    %71 = vector.load %arg2[%c1_30, %c0_31, %c0_32] : memref<9x8x512xf32, #tpu.memory_space<vmem>>, vector<1x8x512xf32>
    %72 = vector.shape_cast %71 : vector<1x8x512xf32> to vector<8x512xf32>
    %73 = arith.mulf %70, %72 : vector<8x512xf32>
    %74 = vector.extract_strided_slice %63 {offsets = [16, 0], sizes = [8, 512], strides = [1, 1]} : vector<72x512xf32> to vector<8x512xf32>
    %c15_i32_33 = arith.constant 15 : i32
    %75 = tpu.dynamic_rotate %74 by %c15_i32_33 dim 1 : vector<8x512xf32>, i32 -> vector<8x512xf32>
    %c2_34 = arith.constant 2 : index
    %c0_35 = arith.constant 0 : index
    %c0_36 = arith.constant 0 : index
    %76 = vector.load %arg2[%c2_34, %c0_35, %c0_36] : memref<9x8x512xf32, #tpu.memory_space<vmem>>, vector<1x8x512xf32>
    %77 = vector.shape_cast %76 : vector<1x8x512xf32> to vector<8x512xf32>
    %78 = arith.mulf %75, %77 : vector<8x512xf32>
    %79 = vector.extract_strided_slice %63 {offsets = [24, 0], sizes = [8, 512], strides = [1, 1]} : vector<72x512xf32> to vector<8x512xf32>
    %c1_i32_37 = arith.constant 1 : i32
    %80 = tpu.dynamic_rotate %79 by %c1_i32_37 dim 1 : vector<8x512xf32>, i32 -> vector<8x512xf32>
    %c3_38 = arith.constant 3 : index
    %c0_39 = arith.constant 0 : index
    %c0_40 = arith.constant 0 : index
    %81 = vector.load %arg2[%c3_38, %c0_39, %c0_40] : memref<9x8x512xf32, #tpu.memory_space<vmem>>, vector<1x8x512xf32>
    %82 = vector.shape_cast %81 : vector<1x8x512xf32> to vector<8x512xf32>
    %83 = arith.mulf %80, %82 : vector<8x512xf32>
    %84 = vector.extract_strided_slice %63 {offsets = [32, 0], sizes = [8, 512], strides = [1, 1]} : vector<72x512xf32> to vector<8x512xf32>
    %85 = vector.extract_strided_slice %63 {offsets = [40, 0], sizes = [8, 512], strides = [1, 1]} : vector<72x512xf32> to vector<8x512xf32>
    %c511_i32_41 = arith.constant 511 : i32
    %86 = tpu.dynamic_rotate %85 by %c511_i32_41 dim 1 : vector<8x512xf32>, i32 -> vector<8x512xf32>
    %c5_42 = arith.constant 5 : index
    %c0_43 = arith.constant 0 : index
    %c0_44 = arith.constant 0 : index
    %87 = vector.load %arg2[%c5_42, %c0_43, %c0_44] : memref<9x8x512xf32, #tpu.memory_space<vmem>>, vector<1x8x512xf32>
    %88 = vector.shape_cast %87 : vector<1x8x512xf32> to vector<8x512xf32>
    %89 = arith.mulf %86, %88 : vector<8x512xf32>
    %90 = vector.extract_strided_slice %63 {offsets = [48, 0], sizes = [8, 512], strides = [1, 1]} : vector<72x512xf32> to vector<8x512xf32>
    %c497_i32_45 = arith.constant 497 : i32
    %91 = tpu.dynamic_rotate %90 by %c497_i32_45 dim 1 : vector<8x512xf32>, i32 -> vector<8x512xf32>
    %c6_46 = arith.constant 6 : index
    %c0_47 = arith.constant 0 : index
    %c0_48 = arith.constant 0 : index
    %92 = vector.load %arg2[%c6_46, %c0_47, %c0_48] : memref<9x8x512xf32, #tpu.memory_space<vmem>>, vector<1x8x512xf32>
    %93 = vector.shape_cast %92 : vector<1x8x512xf32> to vector<8x512xf32>
    %94 = arith.mulf %91, %93 : vector<8x512xf32>
    %95 = vector.extract_strided_slice %63 {offsets = [56, 0], sizes = [8, 512], strides = [1, 1]} : vector<72x512xf32> to vector<8x512xf32>
    %c496_i32_49 = arith.constant 496 : i32
    %96 = tpu.dynamic_rotate %95 by %c496_i32_49 dim 1 : vector<8x512xf32>, i32 -> vector<8x512xf32>
    %c7_50 = arith.constant 7 : index
    %c0_51 = arith.constant 0 : index
    %c0_52 = arith.constant 0 : index
    %97 = vector.load %arg2[%c7_50, %c0_51, %c0_52] : memref<9x8x512xf32, #tpu.memory_space<vmem>>, vector<1x8x512xf32>
    %98 = vector.shape_cast %97 : vector<1x8x512xf32> to vector<8x512xf32>
    %99 = arith.mulf %96, %98 : vector<8x512xf32>
    %100 = vector.extract_strided_slice %63 {offsets = [64, 0], sizes = [8, 512], strides = [1, 1]} : vector<72x512xf32> to vector<8x512xf32>
    %c495_i32_53 = arith.constant 495 : i32
    %101 = tpu.dynamic_rotate %100 by %c495_i32_53 dim 1 : vector<8x512xf32>, i32 -> vector<8x512xf32>
    %c8_54 = arith.constant 8 : index
    %c0_55 = arith.constant 0 : index
    %c0_56 = arith.constant 0 : index
    %102 = vector.load %arg2[%c8_54, %c0_55, %c0_56] : memref<9x8x512xf32, #tpu.memory_space<vmem>>, vector<1x8x512xf32>
    %103 = vector.shape_cast %102 : vector<1x8x512xf32> to vector<8x512xf32>
    %104 = arith.mulf %101, %103 : vector<8x512xf32>
    %105 = arith.addf %68, %73 : vector<8x512xf32>
    %106 = arith.addf %78, %83 : vector<8x512xf32>
    %107 = arith.addf %84, %89 : vector<8x512xf32>
    %108 = arith.addf %94, %99 : vector<8x512xf32>
    %109 = arith.addf %105, %106 : vector<8x512xf32>
    %110 = arith.addf %107, %108 : vector<8x512xf32>
    %111 = arith.addf %109, %110 : vector<8x512xf32>
    %112 = arith.addf %111, %104 : vector<8x512xf32>
    %c184 = arith.constant 184 : index
    %c0_57 = arith.constant 0 : index
    %113 = vector.load %arg3[%c184, %c0_57] : memref<384x16xf32, #tpu.memory_space<vmem>>, vector<8x1xf32>
    %114 = vector.broadcast %113 : vector<8x1xf32> to vector<8x512xf32>
    %115 = arith.addf %112, %114 : vector<8x512xf32>
    %cst_58 = arith.constant 0.000000e+00 : f32
    %116 = vector.broadcast %cst_58 : f32 to vector<8x512xf32>
    %117 = arith.subf %116, %115 : vector<8x512xf32>
    %118 = math.exp %117 : vector<8x512xf32>
    %cst_59 = arith.constant 1.000000e+00 : f32
    %119 = vector.broadcast %cst_59 : f32 to vector<8x512xf32>
    %120 = arith.addf %119, %118 : vector<8x512xf32>
    %121 = tpu.reciprocal %120 {approx = true} : vector<8x512xf32> -> vector<8x512xf32>
    %122 = arith.mulf %115, %121 : vector<8x512xf32>
    %c240 = arith.constant 240 : index
    %c0_60 = arith.constant 0 : index
    %123 = vector.load %arg3[%c240, %c0_60] : memref<384x16xf32, #tpu.memory_space<vmem>>, vector<4x1xf32>
    %c17_i32_61 = arith.constant 17 : i32
    %124 = tpu.dynamic_rotate %0 by %c17_i32_61 dim 1 : vector<4x512xf32>, i32 -> vector<4x512xf32>
    %c0_62 = arith.constant 0 : index
    %c0_63 = arith.constant 0 : index
    %c0_64 = arith.constant 0 : index
    %125 = vector.load %arg2[%c0_62, %c0_63, %c0_64] : memref<9x8x512xf32, #tpu.memory_space<vmem>>, vector<1x8x512xf32>
    %126 = vector.shape_cast %125 : vector<1x8x512xf32> to vector<8x512xf32>
    %127 = vector.extract_strided_slice %126 {offsets = [0, 0], sizes = [4, 512], strides = [1, 1]} : vector<8x512xf32> to vector<4x512xf32>
    %128 = arith.mulf %124, %127 : vector<4x512xf32>
    %129 = vector.broadcast %123 : vector<4x1xf32> to vector<4x512xf32>
    %130 = arith.mulf %129, %128 : vector<4x512xf32>
    %c248 = arith.constant 248 : index
    %c0_65 = arith.constant 0 : index
    %131 = vector.load %arg3[%c248, %c0_65] : memref<384x16xf32, #tpu.memory_space<vmem>>, vector<4x1xf32>
    %c16_i32_66 = arith.constant 16 : i32
    %132 = tpu.dynamic_rotate %0 by %c16_i32_66 dim 1 : vector<4x512xf32>, i32 -> vector<4x512xf32>
    %c1_67 = arith.constant 1 : index
    %c0_68 = arith.constant 0 : index
    %c0_69 = arith.constant 0 : index
    %133 = vector.load %arg2[%c1_67, %c0_68, %c0_69] : memref<9x8x512xf32, #tpu.memory_space<vmem>>, vector<1x8x512xf32>
    %134 = vector.shape_cast %133 : vector<1x8x512xf32> to vector<8x512xf32>
    %135 = vector.extract_strided_slice %134 {offsets = [0, 0], sizes = [4, 512], strides = [1, 1]} : vector<8x512xf32> to vector<4x512xf32>
    %136 = arith.mulf %132, %135 : vector<4x512xf32>
    %137 = vector.broadcast %131 : vector<4x1xf32> to vector<4x512xf32>
    %138 = arith.mulf %137, %136 : vector<4x512xf32>
    %c256 = arith.constant 256 : index
    %c0_70 = arith.constant 0 : index
    %139 = vector.load %arg3[%c256, %c0_70] : memref<384x16xf32, #tpu.memory_space<vmem>>, vector<4x1xf32>
    %c15_i32_71 = arith.constant 15 : i32
    %140 = tpu.dynamic_rotate %0 by %c15_i32_71 dim 1 : vector<4x512xf32>, i32 -> vector<4x512xf32>
    %c2_72 = arith.constant 2 : index
    %c0_73 = arith.constant 0 : index
    %c0_74 = arith.constant 0 : index
    %141 = vector.load %arg2[%c2_72, %c0_73, %c0_74] : memref<9x8x512xf32, #tpu.memory_space<vmem>>, vector<1x8x512xf32>
    %142 = vector.shape_cast %141 : vector<1x8x512xf32> to vector<8x512xf32>
    %143 = vector.extract_strided_slice %142 {offsets = [0, 0], sizes = [4, 512], strides = [1, 1]} : vector<8x512xf32> to vector<4x512xf32>
    %144 = arith.mulf %140, %143 : vector<4x512xf32>
    %145 = vector.broadcast %139 : vector<4x1xf32> to vector<4x512xf32>
    %146 = arith.mulf %145, %144 : vector<4x512xf32>
    %c264 = arith.constant 264 : index
    %c0_75 = arith.constant 0 : index
    %147 = vector.load %arg3[%c264, %c0_75] : memref<384x16xf32, #tpu.memory_space<vmem>>, vector<4x1xf32>
    %c1_i32_76 = arith.constant 1 : i32
    %148 = tpu.dynamic_rotate %0 by %c1_i32_76 dim 1 : vector<4x512xf32>, i32 -> vector<4x512xf32>
    %c3_77 = arith.constant 3 : index
    %c0_78 = arith.constant 0 : index
    %c0_79 = arith.constant 0 : index
    %149 = vector.load %arg2[%c3_77, %c0_78, %c0_79] : memref<9x8x512xf32, #tpu.memory_space<vmem>>, vector<1x8x512xf32>
    %150 = vector.shape_cast %149 : vector<1x8x512xf32> to vector<8x512xf32>
    %151 = vector.extract_strided_slice %150 {offsets = [0, 0], sizes = [4, 512], strides = [1, 1]} : vector<8x512xf32> to vector<4x512xf32>
    %152 = arith.mulf %148, %151 : vector<4x512xf32>
    %153 = vector.broadcast %147 : vector<4x1xf32> to vector<4x512xf32>
    %154 = arith.mulf %153, %152 : vector<4x512xf32>
    %c272 = arith.constant 272 : index
    %c0_80 = arith.constant 0 : index
    %155 = vector.load %arg3[%c272, %c0_80] : memref<384x16xf32, #tpu.memory_space<vmem>>, vector<4x1xf32>
    %156 = vector.broadcast %155 : vector<4x1xf32> to vector<4x512xf32>
    %157 = arith.mulf %156, %0 : vector<4x512xf32>
    %c280 = arith.constant 280 : index
    %c0_81 = arith.constant 0 : index
    %158 = vector.load %arg3[%c280, %c0_81] : memref<384x16xf32, #tpu.memory_space<vmem>>, vector<4x1xf32>
    %c511_i32_82 = arith.constant 511 : i32
    %159 = tpu.dynamic_rotate %0 by %c511_i32_82 dim 1 : vector<4x512xf32>, i32 -> vector<4x512xf32>
    %c5_83 = arith.constant 5 : index
    %c0_84 = arith.constant 0 : index
    %c0_85 = arith.constant 0 : index
    %160 = vector.load %arg2[%c5_83, %c0_84, %c0_85] : memref<9x8x512xf32, #tpu.memory_space<vmem>>, vector<1x8x512xf32>
    %161 = vector.shape_cast %160 : vector<1x8x512xf32> to vector<8x512xf32>
    %162 = vector.extract_strided_slice %161 {offsets = [0, 0], sizes = [4, 512], strides = [1, 1]} : vector<8x512xf32> to vector<4x512xf32>
    %163 = arith.mulf %159, %162 : vector<4x512xf32>
    %164 = vector.broadcast %158 : vector<4x1xf32> to vector<4x512xf32>
    %165 = arith.mulf %164, %163 : vector<4x512xf32>
    %c288 = arith.constant 288 : index
    %c0_86 = arith.constant 0 : index
    %166 = vector.load %arg3[%c288, %c0_86] : memref<384x16xf32, #tpu.memory_space<vmem>>, vector<4x1xf32>
    %c497_i32_87 = arith.constant 497 : i32
    %167 = tpu.dynamic_rotate %0 by %c497_i32_87 dim 1 : vector<4x512xf32>, i32 -> vector<4x512xf32>
    %c6_88 = arith.constant 6 : index
    %c0_89 = arith.constant 0 : index
    %c0_90 = arith.constant 0 : index
    %168 = vector.load %arg2[%c6_88, %c0_89, %c0_90] : memref<9x8x512xf32, #tpu.memory_space<vmem>>, vector<1x8x512xf32>
    %169 = vector.shape_cast %168 : vector<1x8x512xf32> to vector<8x512xf32>
    %170 = vector.extract_strided_slice %169 {offsets = [0, 0], sizes = [4, 512], strides = [1, 1]} : vector<8x512xf32> to vector<4x512xf32>
    %171 = arith.mulf %167, %170 : vector<4x512xf32>
    %172 = vector.broadcast %166 : vector<4x1xf32> to vector<4x512xf32>
    %173 = arith.mulf %172, %171 : vector<4x512xf32>
    %c296 = arith.constant 296 : index
    %c0_91 = arith.constant 0 : index
    %174 = vector.load %arg3[%c296, %c0_91] : memref<384x16xf32, #tpu.memory_space<vmem>>, vector<4x1xf32>
    %c496_i32_92 = arith.constant 496 : i32
    %175 = tpu.dynamic_rotate %0 by %c496_i32_92 dim 1 : vector<4x512xf32>, i32 -> vector<4x512xf32>
    %c7_93 = arith.constant 7 : index
    %c0_94 = arith.constant 0 : index
    %c0_95 = arith.constant 0 : index
    %176 = vector.load %arg2[%c7_93, %c0_94, %c0_95] : memref<9x8x512xf32, #tpu.memory_space<vmem>>, vector<1x8x512xf32>
    %177 = vector.shape_cast %176 : vector<1x8x512xf32> to vector<8x512xf32>
    %178 = vector.extract_strided_slice %177 {offsets = [0, 0], sizes = [4, 512], strides = [1, 1]} : vector<8x512xf32> to vector<4x512xf32>
    %179 = arith.mulf %175, %178 : vector<4x512xf32>
    %180 = vector.broadcast %174 : vector<4x1xf32> to vector<4x512xf32>
    %181 = arith.mulf %180, %179 : vector<4x512xf32>
    %c304 = arith.constant 304 : index
    %c0_96 = arith.constant 0 : index
    %182 = vector.load %arg3[%c304, %c0_96] : memref<384x16xf32, #tpu.memory_space<vmem>>, vector<4x1xf32>
    %c495_i32_97 = arith.constant 495 : i32
    %183 = tpu.dynamic_rotate %0 by %c495_i32_97 dim 1 : vector<4x512xf32>, i32 -> vector<4x512xf32>
    %c8_98 = arith.constant 8 : index
    %c0_99 = arith.constant 0 : index
    %c0_100 = arith.constant 0 : index
    %184 = vector.load %arg2[%c8_98, %c0_99, %c0_100] : memref<9x8x512xf32, #tpu.memory_space<vmem>>, vector<1x8x512xf32>
    %185 = vector.shape_cast %184 : vector<1x8x512xf32> to vector<8x512xf32>
    %186 = vector.extract_strided_slice %185 {offsets = [0, 0], sizes = [4, 512], strides = [1, 1]} : vector<8x512xf32> to vector<4x512xf32>
    %187 = arith.mulf %183, %186 : vector<4x512xf32>
    %188 = vector.broadcast %182 : vector<4x1xf32> to vector<4x512xf32>
    %189 = arith.mulf %188, %187 : vector<4x512xf32>
    %190 = arith.addf %130, %138 : vector<4x512xf32>
    %191 = arith.addf %146, %154 : vector<4x512xf32>
    %192 = arith.addf %157, %165 : vector<4x512xf32>
    %193 = arith.addf %173, %181 : vector<4x512xf32>
    %194 = arith.addf %190, %191 : vector<4x512xf32>
    %195 = arith.addf %192, %193 : vector<4x512xf32>
    %196 = arith.addf %194, %195 : vector<4x512xf32>
    %197 = arith.addf %196, %189 : vector<4x512xf32>
    %c192 = arith.constant 192 : index
    %c0_101 = arith.constant 0 : index
    %198 = vector.load %arg3[%c192, %c0_101] : memref<384x16xf32, #tpu.memory_space<vmem>>, vector<4x1xf32>
    %199 = vector.broadcast %198 : vector<4x1xf32> to vector<4x512xf32>
    %200 = arith.addf %197, %199 : vector<4x512xf32>
    %cst_102 = arith.constant 0.000000e+00 : f32
    %201 = vector.broadcast %cst_102 : f32 to vector<4x512xf32>
    %202 = arith.subf %201, %200 : vector<4x512xf32>
    %203 = math.exp %202 : vector<4x512xf32>
    %cst_103 = arith.constant 1.000000e+00 : f32
    %204 = vector.broadcast %cst_103 : f32 to vector<4x512xf32>
    %205 = arith.addf %204, %203 : vector<4x512xf32>
    %206 = tpu.reciprocal %205 {approx = true} : vector<4x512xf32> -> vector<4x512xf32>
    %207 = arith.mulf %200, %206 : vector<4x512xf32>
    %c144 = arith.constant 144 : index
    %c0_104 = arith.constant 0 : index
    %208 = vector.load %arg3[%c144, %c0_104] : memref<384x16xf32, #tpu.memory_space<vmem>>, vector<8x4xf32>
    %cst_105 = arith.constant dense<0.000000e+00> : vector<8x512xf32>
    %209 = tpu.matmul %208, %207, %cst_105 {dimension_numbers = #tpu.dot_dimension_numbers<[1], [0], [0], [1], [0, 0, 1, 1], [], []>} : vector<8x4xf32>, vector<4x512xf32>, vector<8x512xf32> -> vector<8x512xf32>
    %c200 = arith.constant 200 : index
    %c0_106 = arith.constant 0 : index
    %210 = vector.load %arg3[%c200, %c0_106] : memref<384x16xf32, #tpu.memory_space<vmem>>, vector<8x1xf32>
    %211 = vector.broadcast %210 : vector<8x1xf32> to vector<8x512xf32>
    %212 = arith.addf %209, %211 : vector<8x512xf32>
    %cst_107 = arith.constant 0.000000e+00 : f32
    %213 = vector.broadcast %cst_107 : f32 to vector<8x512xf32>
    %214 = arith.subf %213, %212 : vector<8x512xf32>
    %215 = math.exp %214 : vector<8x512xf32>
    %cst_108 = arith.constant 1.000000e+00 : f32
    %216 = vector.broadcast %cst_108 : f32 to vector<8x512xf32>
    %217 = arith.addf %216, %215 : vector<8x512xf32>
    %218 = tpu.reciprocal %217 {approx = true} : vector<8x512xf32> -> vector<8x512xf32>
    %219 = arith.mulf %212, %218 : vector<8x512xf32>
    %c312 = arith.constant 312 : index
    %c0_109 = arith.constant 0 : index
    %220 = vector.load %arg3[%c312, %c0_109] : memref<384x16xf32, #tpu.memory_space<vmem>>, vector<8x1xf32>
    %c17_i32_110 = arith.constant 17 : i32
    %221 = tpu.dynamic_rotate %219 by %c17_i32_110 dim 1 : vector<8x512xf32>, i32 -> vector<8x512xf32>
    %c0_111 = arith.constant 0 : index
    %c0_112 = arith.constant 0 : index
    %c0_113 = arith.constant 0 : index
    %222 = vector.load %arg2[%c0_111, %c0_112, %c0_113] : memref<9x8x512xf32, #tpu.memory_space<vmem>>, vector<1x8x512xf32>
    %223 = vector.shape_cast %222 : vector<1x8x512xf32> to vector<8x512xf32>
    %224 = arith.mulf %221, %223 : vector<8x512xf32>
    %225 = vector.broadcast %220 : vector<8x1xf32> to vector<8x512xf32>
    %226 = arith.mulf %225, %224 : vector<8x512xf32>
    %c320 = arith.constant 320 : index
    %c0_114 = arith.constant 0 : index
    %227 = vector.load %arg3[%c320, %c0_114] : memref<384x16xf32, #tpu.memory_space<vmem>>, vector<8x1xf32>
    %c16_i32_115 = arith.constant 16 : i32
    %228 = tpu.dynamic_rotate %219 by %c16_i32_115 dim 1 : vector<8x512xf32>, i32 -> vector<8x512xf32>
    %c1_116 = arith.constant 1 : index
    %c0_117 = arith.constant 0 : index
    %c0_118 = arith.constant 0 : index
    %229 = vector.load %arg2[%c1_116, %c0_117, %c0_118] : memref<9x8x512xf32, #tpu.memory_space<vmem>>, vector<1x8x512xf32>
    %230 = vector.shape_cast %229 : vector<1x8x512xf32> to vector<8x512xf32>
    %231 = arith.mulf %228, %230 : vector<8x512xf32>
    %232 = vector.broadcast %227 : vector<8x1xf32> to vector<8x512xf32>
    %233 = arith.mulf %232, %231 : vector<8x512xf32>
    %c328 = arith.constant 328 : index
    %c0_119 = arith.constant 0 : index
    %234 = vector.load %arg3[%c328, %c0_119] : memref<384x16xf32, #tpu.memory_space<vmem>>, vector<8x1xf32>
    %c15_i32_120 = arith.constant 15 : i32
    %235 = tpu.dynamic_rotate %219 by %c15_i32_120 dim 1 : vector<8x512xf32>, i32 -> vector<8x512xf32>
    %c2_121 = arith.constant 2 : index
    %c0_122 = arith.constant 0 : index
    %c0_123 = arith.constant 0 : index
    %236 = vector.load %arg2[%c2_121, %c0_122, %c0_123] : memref<9x8x512xf32, #tpu.memory_space<vmem>>, vector<1x8x512xf32>
    %237 = vector.shape_cast %236 : vector<1x8x512xf32> to vector<8x512xf32>
    %238 = arith.mulf %235, %237 : vector<8x512xf32>
    %239 = vector.broadcast %234 : vector<8x1xf32> to vector<8x512xf32>
    %240 = arith.mulf %239, %238 : vector<8x512xf32>
    %c336 = arith.constant 336 : index
    %c0_124 = arith.constant 0 : index
    %241 = vector.load %arg3[%c336, %c0_124] : memref<384x16xf32, #tpu.memory_space<vmem>>, vector<8x1xf32>
    %c1_i32_125 = arith.constant 1 : i32
    %242 = tpu.dynamic_rotate %219 by %c1_i32_125 dim 1 : vector<8x512xf32>, i32 -> vector<8x512xf32>
    %c3_126 = arith.constant 3 : index
    %c0_127 = arith.constant 0 : index
    %c0_128 = arith.constant 0 : index
    %243 = vector.load %arg2[%c3_126, %c0_127, %c0_128] : memref<9x8x512xf32, #tpu.memory_space<vmem>>, vector<1x8x512xf32>
    %244 = vector.shape_cast %243 : vector<1x8x512xf32> to vector<8x512xf32>
    %245 = arith.mulf %242, %244 : vector<8x512xf32>
    %246 = vector.broadcast %241 : vector<8x1xf32> to vector<8x512xf32>
    %247 = arith.mulf %246, %245 : vector<8x512xf32>
    %c344 = arith.constant 344 : index
    %c0_129 = arith.constant 0 : index
    %248 = vector.load %arg3[%c344, %c0_129] : memref<384x16xf32, #tpu.memory_space<vmem>>, vector<8x1xf32>
    %249 = vector.broadcast %248 : vector<8x1xf32> to vector<8x512xf32>
    %250 = arith.mulf %249, %219 : vector<8x512xf32>
    %c352 = arith.constant 352 : index
    %c0_130 = arith.constant 0 : index
    %251 = vector.load %arg3[%c352, %c0_130] : memref<384x16xf32, #tpu.memory_space<vmem>>, vector<8x1xf32>
    %c511_i32_131 = arith.constant 511 : i32
    %252 = tpu.dynamic_rotate %219 by %c511_i32_131 dim 1 : vector<8x512xf32>, i32 -> vector<8x512xf32>
    %c5_132 = arith.constant 5 : index
    %c0_133 = arith.constant 0 : index
    %c0_134 = arith.constant 0 : index
    %253 = vector.load %arg2[%c5_132, %c0_133, %c0_134] : memref<9x8x512xf32, #tpu.memory_space<vmem>>, vector<1x8x512xf32>
    %254 = vector.shape_cast %253 : vector<1x8x512xf32> to vector<8x512xf32>
    %255 = arith.mulf %252, %254 : vector<8x512xf32>
    %256 = vector.broadcast %251 : vector<8x1xf32> to vector<8x512xf32>
    %257 = arith.mulf %256, %255 : vector<8x512xf32>
    %c360 = arith.constant 360 : index
    %c0_135 = arith.constant 0 : index
    %258 = vector.load %arg3[%c360, %c0_135] : memref<384x16xf32, #tpu.memory_space<vmem>>, vector<8x1xf32>
    %c497_i32_136 = arith.constant 497 : i32
    %259 = tpu.dynamic_rotate %219 by %c497_i32_136 dim 1 : vector<8x512xf32>, i32 -> vector<8x512xf32>
    %c6_137 = arith.constant 6 : index
    %c0_138 = arith.constant 0 : index
    %c0_139 = arith.constant 0 : index
    %260 = vector.load %arg2[%c6_137, %c0_138, %c0_139] : memref<9x8x512xf32, #tpu.memory_space<vmem>>, vector<1x8x512xf32>
    %261 = vector.shape_cast %260 : vector<1x8x512xf32> to vector<8x512xf32>
    %262 = arith.mulf %259, %261 : vector<8x512xf32>
    %263 = vector.broadcast %258 : vector<8x1xf32> to vector<8x512xf32>
    %264 = arith.mulf %263, %262 : vector<8x512xf32>
    %c368 = arith.constant 368 : index
    %c0_140 = arith.constant 0 : index
    %265 = vector.load %arg3[%c368, %c0_140] : memref<384x16xf32, #tpu.memory_space<vmem>>, vector<8x1xf32>
    %c496_i32_141 = arith.constant 496 : i32
    %266 = tpu.dynamic_rotate %219 by %c496_i32_141 dim 1 : vector<8x512xf32>, i32 -> vector<8x512xf32>
    %c7_142 = arith.constant 7 : index
    %c0_143 = arith.constant 0 : index
    %c0_144 = arith.constant 0 : index
    %267 = vector.load %arg2[%c7_142, %c0_143, %c0_144] : memref<9x8x512xf32, #tpu.memory_space<vmem>>, vector<1x8x512xf32>
    %268 = vector.shape_cast %267 : vector<1x8x512xf32> to vector<8x512xf32>
    %269 = arith.mulf %266, %268 : vector<8x512xf32>
    %270 = vector.broadcast %265 : vector<8x1xf32> to vector<8x512xf32>
    %271 = arith.mulf %270, %269 : vector<8x512xf32>
    %c376 = arith.constant 376 : index
    %c0_145 = arith.constant 0 : index
    %272 = vector.load %arg3[%c376, %c0_145] : memref<384x16xf32, #tpu.memory_space<vmem>>, vector<8x1xf32>
    %c495_i32_146 = arith.constant 495 : i32
    %273 = tpu.dynamic_rotate %219 by %c495_i32_146 dim 1 : vector<8x512xf32>, i32 -> vector<8x512xf32>
    %c8_147 = arith.constant 8 : index
    %c0_148 = arith.constant 0 : index
    %c0_149 = arith.constant 0 : index
    %274 = vector.load %arg2[%c8_147, %c0_148, %c0_149] : memref<9x8x512xf32, #tpu.memory_space<vmem>>, vector<1x8x512xf32>
    %275 = vector.shape_cast %274 : vector<1x8x512xf32> to vector<8x512xf32>
    %276 = arith.mulf %273, %275 : vector<8x512xf32>
    %277 = vector.broadcast %272 : vector<8x1xf32> to vector<8x512xf32>
    %278 = arith.mulf %277, %276 : vector<8x512xf32>
    %279 = arith.addf %226, %233 : vector<8x512xf32>
    %280 = arith.addf %240, %247 : vector<8x512xf32>
    %281 = arith.addf %250, %257 : vector<8x512xf32>
    %282 = arith.addf %264, %271 : vector<8x512xf32>
    %283 = arith.addf %279, %280 : vector<8x512xf32>
    %284 = arith.addf %281, %282 : vector<8x512xf32>
    %285 = arith.addf %283, %284 : vector<8x512xf32>
    %286 = arith.addf %285, %278 : vector<8x512xf32>
    %c208 = arith.constant 208 : index
    %c0_150 = arith.constant 0 : index
    %287 = vector.load %arg3[%c208, %c0_150] : memref<384x16xf32, #tpu.memory_space<vmem>>, vector<8x1xf32>
    %288 = vector.broadcast %287 : vector<8x1xf32> to vector<8x512xf32>
    %289 = arith.addf %286, %288 : vector<8x512xf32>
    %cst_151 = arith.constant 0.000000e+00 : f32
    %290 = vector.broadcast %cst_151 : f32 to vector<8x512xf32>
    %291 = arith.subf %290, %289 : vector<8x512xf32>
    %292 = math.exp %291 : vector<8x512xf32>
    %cst_152 = arith.constant 1.000000e+00 : f32
    %293 = vector.broadcast %cst_152 : f32 to vector<8x512xf32>
    %294 = arith.addf %293, %292 : vector<8x512xf32>
    %295 = tpu.reciprocal %294 {approx = true} : vector<8x512xf32> -> vector<8x512xf32>
    %296 = arith.mulf %289, %295 : vector<8x512xf32>
    %c152 = arith.constant 152 : index
    %c0_153 = arith.constant 0 : index
    %297 = vector.load %arg3[%c152, %c0_153] : memref<384x16xf32, #tpu.memory_space<vmem>>, vector<8x8xf32>
    %cst_154 = arith.constant dense<0.000000e+00> : vector<8x512xf32>
    %298 = tpu.matmul %297, %296, %cst_154 {dimension_numbers = #tpu.dot_dimension_numbers<[1], [0], [0], [1], [0, 0, 1, 1], [], []>} : vector<8x8xf32>, vector<8x512xf32>, vector<8x512xf32> -> vector<8x512xf32>
    %c216 = arith.constant 216 : index
    %c0_155 = arith.constant 0 : index
    %299 = vector.load %arg3[%c216, %c0_155] : memref<384x16xf32, #tpu.memory_space<vmem>>, vector<8x1xf32>
    %300 = vector.broadcast %299 : vector<8x1xf32> to vector<8x512xf32>
    %301 = arith.addf %298, %300 : vector<8x512xf32>
    %cst_156 = arith.constant 0.000000e+00 : f32
    %302 = vector.broadcast %cst_156 : f32 to vector<8x512xf32>
    %303 = arith.subf %302, %301 : vector<8x512xf32>
    %304 = math.exp %303 : vector<8x512xf32>
    %cst_157 = arith.constant 1.000000e+00 : f32
    %305 = vector.broadcast %cst_157 : f32 to vector<8x512xf32>
    %306 = arith.addf %305, %304 : vector<8x512xf32>
    %307 = tpu.reciprocal %306 {approx = true} : vector<8x512xf32> -> vector<8x512xf32>
    %308 = arith.mulf %301, %307 : vector<8x512xf32>
    %c0_158 = arith.constant 0 : index
    %c0_159 = arith.constant 0 : index
    %309 = vector.load %arg5[%c0_158, %c0_159] : memref<16x512xf32, #tpu.memory_space<vmem>>, vector<8x512xf32>
    tpu.vector_store %arg5[%c0_158, %c0_159], %122 {strides = array<i32>} : memref<16x512xf32, #tpu.memory_space<vmem>>, vector<8x512xf32>,
    %c8_160 = arith.constant 8 : index
    %c0_161 = arith.constant 0 : index
    %310 = vector.load %arg5[%c8_160, %c0_161] : memref<16x512xf32, #tpu.memory_space<vmem>>, vector<8x512xf32>
    tpu.vector_store %arg5[%c8_160, %c0_161], %308 {strides = array<i32>} : memref<16x512xf32, #tpu.memory_space<vmem>>, vector<8x512xf32>,
    %c160 = arith.constant 160 : index
    %c0_162 = arith.constant 0 : index
    %311 = vector.load %arg3[%c160, %c0_162] : memref<384x16xf32, #tpu.memory_space<vmem>>, vector<16x16xf32>
    %c0_163 = arith.constant 0 : index
    %c0_164 = arith.constant 0 : index
    %312 = vector.load %arg5[%c0_163, %c0_164] : memref<16x512xf32, #tpu.memory_space<vmem>>, vector<16x512xf32>
    %cst_165 = arith.constant dense<0.000000e+00> : vector<16x512xf32>
    %313 = tpu.matmul %311, %312, %cst_165 {dimension_numbers = #tpu.dot_dimension_numbers<[1], [0], [0], [1], [0, 0, 1, 1], [], []>} : vector<16x16xf32>, vector<16x512xf32>, vector<16x512xf32> -> vector<16x512xf32>
    %c224 = arith.constant 224 : index
    %c0_166 = arith.constant 0 : index
    %314 = vector.load %arg3[%c224, %c0_166] : memref<384x16xf32, #tpu.memory_space<vmem>>, vector<16x1xf32>
    %315 = vector.broadcast %314 : vector<16x1xf32> to vector<16x512xf32>
    %316 = arith.addf %313, %315 : vector<16x512xf32>
    %c0_167 = arith.constant 0 : index
    %c0_168 = arith.constant 0 : index
    %317 = vector.load %arg4[%c0_167, %c0_168] : memref<16x512xf32, #tpu.memory_space<vmem>>, vector<16x512xf32>
    tpu.vector_store %arg4[%c0_167, %c0_168], %316 {strides = array<i32>} : memref<16x512xf32, #tpu.memory_space<vmem>>, vector<16x512xf32>,
    return
  }
  func.func @transform_0(%arg0: i32) -> (i32, i32) {
    %c0_i32 = arith.constant 0 : i32
    %c0_i32_0 = arith.constant 0 : i32
    return %c0_i32, %arg0 : i32, i32
  }
  func.func @transform_1(%arg0: i32) -> (i32, i32, i32) {
    %c0_i32 = arith.constant 0 : i32
    %c0_i32_0 = arith.constant 0 : i32
    %c0_i32_1 = arith.constant 0 : i32
    %c0_i32_2 = arith.constant 0 : i32
    return %c0_i32, %c0_i32_0, %c0_i32_1 : i32, i32, i32
  }
  func.func @transform_2(%arg0: i32) -> (i32, i32) {
    %c0_i32 = arith.constant 0 : i32
    %c0_i32_0 = arith.constant 0 : i32
    %c0_i32_1 = arith.constant 0 : i32
    return %c0_i32, %c0_i32_0 : i32, i32
  }
  func.func @transform_3(%arg0: i32) -> (i32, i32) {
    %c0_i32 = arith.constant 0 : i32
    %c0_i32_0 = arith.constant 0 : i32
    return %c0_i32, %arg0 : i32, i32
  }
}

</mosaic_0001>

<bundles_post_ra>
// kernel: forward.1
= control target key start
LH: loop header
LB: loop body
LE: loop exit
PB: predicated region body
PF: predicated region fallthrough
CT: control target
= control target key end

     0   :  { %8 = vsyncpa [#allocation4], 0  ;;  %s2397_s12 = smov [#allocation3]   ;;  %s4036_s0 = inlined_call_operand.vmem [shape: f32[4,512], index: 0, kind: input, shape index: {}]   ;;  %s4037_s1 = inlined_call_operand.hbm [shape: f32[9,8,512], index: 1, kind: input, shape index: {}]   ;;  %s4038_s2 = inlined_call_operand.vmem [shape: f32[384,16], index: 2, kind: input, shape index: {}]   ;;  %s4039_s3 = inlined_call_operand.vmem [shape: f32[16,512], index: 3, kind: output, shape index: {}]  }
   0x1   :  { %s16_s13 = sshll.u32 %s2397_s12, 4  ;;  %s2373_s16 = scalar_lea.hbm %s4037_s1, 4608  ;;  %s17_s13 = int_to_ptr.vmem [resolvable:$true] %s16_s13 }
   0x2   :  { %p2374_p0 = scmp.ne.s32.totalorder %s4037_s1, %s2373_s16  ;;  %p2377_p1 = scmp.lt.u32.totalorder %s2373_s16, %s4037_s1 }
   0x4   :  { %p2379_p2 = pnand %p2377_p1, %p2374_p0 }
   0x6   :  { %2382 = shalt.err (!%p2379_p2)
}
   0x7   :  { %s2383_s21 = scalar_lea.vmem %s17_s13, 4608  ;;  %p2388_p4 = scmp.lt.s32.totalorder %s17_s13, %s17_s13 }
   0x8   :  { %p2384_p3 = scmp.ne.s32.totalorder %s17_s13, %s2383_s21  ;;  %p2389_p5 = scmp.lt.s32.totalorder %s2383_s21, %s2383_s21 }
   0xa   :  { %p2390_p6 = por %p2389_p5, %p2388_p4 }
   0xc   :  { %p2391_p7 = pnand %p2390_p6, %p2384_p3 }
   0xe   :  { %2394 = shalt.err (!%p2391_p7)
}
   0xf   :  { %s2398_s22 = smov 512   ;;  %s2399_s23 = smov 32  }
  0x10   :  { %22 = dma.hbm_to_vmem [thread:$0]  %s4037_s1, 4608, %s17_s13, [#allocation4], %s2398_s22, %s2398_s22, %s2399_s23  }
  0x11   :  { %2395 = dma.done.wait [#allocation4], 4608  }
  0x12   :  { %2396 = vsyncadd [#allocation4], 4294962688  ;;  %v4040_v0 = vmov 0.0   ;;  %v2401_v1 = vmov 0   ;;  %v2447_v2 = vld [vmem:[%s4036_s0] sm:$0xff]  ;;  %vm71_vm0 = vcmask 1043456  }
  0x13   :  { %144 = vmatprep.mubr.f32.mxu0 %v4040_v0  ;;  %263 = vmatprep.mubr.f32.mxu1 %v4040_v0  ;;  %v2452_v3 = vld [vmem:[%s4036_s0 + $0x8] sm:$0xff]  ;;  %v2456_v4 = vcombine.high %v2447_v2, %v2447_v2  ;;  %v30_v6 = vld [vmem:[%s4038_s2] sm:$0xff]  ;;  %vm43_vm1 = vcmask 31744   ;;  %v527_v7 = vld [vmem:[%s4038_s2 + $0xb0] sm:$0xff]  ;;  %s2402_s30 = smov 17   ;;  %s2403_s7 = smov 16  }
  0x14   :  { %2241 = vset.pattern.permute.xlu0 %v2401_v1  ;;  %2242 = vset.pattern.permute.xlu1 %v2401_v1  ;;  %4095 = vst [vmem:[#allocation6_spill] sm:$0xff] %v2452_v3  ;;  %v2460_v5 = vcombine.high %v2452_v3, %v2452_v3  ;;  %v1058_v8 = vld [vmem:[%s4038_s2 + $0xf8] sm:$0xf]  ;;  %v31_v9 = vld [vmem:[%s4038_s2 + $0x8] sm:$0xff]  ;;  %v1030_v10 = vld [vmem:[%s4038_s2 + $0xf0] sm:$0xf] }
  0x15   :  { %4096 = vst [vmem:[#allocation7_spill] sm:$0xff] %v2456_v4  ;;  %2168 = vmatprep.subr.msk.mxu0 %vm71_vm0, %v2456_v4  ;;  %530 = vperm.xlu0 %2241, %v527_v7   ;;  %v1110_v11 = vld [vmem:[%s4038_s2 + $0x108] sm:$0xf]  ;;  %v32_v12 = vld [vmem:[%s4038_s2 + $0x10] sm:$0xff]  ;;  %v1084_v13 = vld [vmem:[%s4038_s2 + $0x100] sm:$0xf] }
  0x16   :  { %4097 = vst [vmem:[#allocation8_spill] sm:$0xff] %v2460_v5  ;;  %2179 = vmatprep.subr.msk.mxu1 %vm71_vm0, %v2460_v5  ;;  %2169 = vmatpush1.msk.msra.mxu0 %vm71_vm0, %v2447_v2  ;;  %v1146_v14 = vld [vmem:[%s4038_s2 + $0x118] sm:$0xf]  ;;  %v1136_v16 = vld [vmem:[%s4038_s2 + $0x110] sm:$0xf]  ;;  %v34_v18 = vld [vmem:[%s4038_s2 + $0x20] sm:$0xff] }
  0x17   :  { %2180 = vmatpush1.msk.msra.mxu1 %vm71_vm0, %v2452_v3  ;;  %2170 = vmatmul.mubr.msk.f32.vlgmr.msra.gmra.mrb[0].mxu0 %vm43_vm1, %v30_v6  ;;  %v33_v15 = vld [vmem:[%s4038_s2 + $0x18] sm:$0xff]  ;;  %v1198_v17 = vld [vmem:[%s4038_s2 + $0x128] sm:$0xf]  ;;  %v1172_v19 = vld [vmem:[%s4038_s2 + $0x120] sm:$0xf]  ;;  %s2404_s10 = smov 15  }
  0x18   :  { %2181 = vmatmul.mubr.msk.f32.vlgmr.msra.gmra.mrb[0].mxu1 %vm43_vm1, %v30_v6  ;;  %150 = vmatprep.mubr.f32.mxu0 %v4040_v0  ;;  %v35_v20 = vld [vmem:[%s4038_s2 + $0x28] sm:$0xff]  ;;  %v36_v21 = vld [vmem:[%s4038_s2 + $0x30] sm:$0xff]  ;;  %v37_v22 = vld [vmem:[%s4038_s2 + $0x38] sm:$0xff]  ;;  %s2405_s11 = smov 1   ;;  %s2406_s12 = smov 127   ;;  %vm570_vm10 = vcmask 64512  }
  0x19   :  { %269 = vmatprep.mubr.f32.mxu1 %v4040_v0  ;;  %1077 = vperm.xlu1 %2242, %v1058_v8   ;;  %v38_v23 = vld [vmem:[%s4038_s2 + $0x40] sm:$0xff]  ;;  %s2407_s13 = smov 113   ;;  %s2408_s14 = smov 112   ;;  %vm1994_vm11 = vcmask 130048  }
  0x1a   :  { %1051 = vperm.xlu0 %2241, %v1030_v10   ;;  %s2409_s15 = smov 111  }
  0x1b   :  { %2171 = vmatmul.mubr.msk.f32.gmra.mrb[2].mxu0 %vm43_vm1, %v31_v9 }
  0x1c   :  { %2182 = vmatmul.mubr.msk.f32.gmra.mrb[2].mxu1 %vm43_vm1, %v31_v9  ;;  %156 = vmatprep.mubr.f32.mxu0 %v4040_v0 }
  0x1d   :  { %275 = vmatprep.mubr.f32.mxu1 %v4040_v0  ;;  %1129 = vperm.xlu1 %2242, %v1110_v11  }
  0x1e   :  { %1103 = vperm.xlu0 %2241, %v1084_v13  }
  0x1f   :  { %2172 = vmatmul.mubr.msk.f32.gmra.mrb[4].mxu0 %vm43_vm1, %v32_v12 }
  0x20   :  { %2183 = vmatmul.mubr.msk.f32.gmra.mrb[4].mxu1 %vm43_vm1, %v32_v12  ;;  %162 = vmatprep.mubr.f32.mxu0 %v4040_v0 }
  0x21   :  { %281 = vmatprep.mubr.f32.mxu1 %v4040_v0  ;;  %1165 = vperm.xlu1 %2242, %v1146_v14  }
  0x22   :  { %1139 = vperm.xlu0 %2241, %v1136_v16   ;;  %v1224_v16 = vld [vmem:[%s4038_s2 + $0x130] sm:$0xf] }
  0x23   :  { %2173 = vmatmul.mubr.msk.f32.gmra.mrb[6].mxu0 %vm43_vm1, %v33_v15 }
  0x24   :  { %2184 = vmatmul.mubr.msk.f32.gmra.mrb[6].mxu1 %vm43_vm1, %v33_v15  ;;  %168 = vmatprep.mubr.f32.mxu0 %v4040_v0 }
  0x25   :  { %287 = vmatprep.mubr.f32.mxu1 %v4040_v0  ;;  %1217 = vperm.xlu1 %2242, %v1198_v17  }
  0x26   :  { %1191 = vperm.xlu0 %2241, %v1172_v19  }
  0x27   :  { %2174 = vmatmul.mubr.msk.f32.gmra.mrb[8].mxu0 %vm43_vm1, %v34_v18 }
  0x28   :  { %2185 = vmatmul.mubr.msk.f32.gmra.mrb[8].mxu1 %vm43_vm1, %v34_v18  ;;  %174 = vmatprep.mubr.f32.mxu0 %v4040_v0 }
  0x29   :  { %293 = vmatprep.mubr.f32.mxu1 %v4040_v0  ;;  %1035 = vrot.lane.b32.xlu1 %v2456_v4, %s2402_s30 }
  0x2a   :  { %1033 = vrot.lane.b32.xlu0 %v2447_v2, %s2402_s30 }
  0x2b   :  { %2175 = vmatmul.mubr.msk.f32.gmra.mrb[10].mxu0 %vm43_vm1, %v35_v20 }
  0x2c   :  { %2186 = vmatmul.mubr.msk.f32.gmra.mrb[10].mxu1 %vm43_vm1, %v35_v20  ;;  %180 = vmatprep.mubr.f32.mxu0 %v4040_v0 }
  0x2d   :  { %299 = vmatprep.mubr.f32.mxu1 %v4040_v0  ;;  %1039 = vrot.lane.b32.xlu1 %v2460_v5, %s2402_s30 }
  0x2e   :  { %1037 = vrot.lane.b32.xlu0 %v2452_v3, %s2402_s30 }
  0x2f   :  { %2176 = vmatmul.mubr.msk.f32.gmra.mrb[12].mxu0 %vm43_vm1, %v36_v21 }
  0x30   :  { %2187 = vmatmul.mubr.msk.f32.gmra.mrb[12].mxu1 %vm43_vm1, %v36_v21  ;;  %186 = vmatprep.mubr.f32.mxu0 %v4040_v0  ;;  %v1317_v21 = vld [vmem:[%s4038_s2 + $0xc8] sm:$0xff] }
  0x31   :  { %305 = vmatprep.mubr.f32.mxu1 %v4040_v0  ;;  %1061 = vrot.lane.b32.xlu1 %v2456_v4, %s2403_s7 }
  0x32   :  { %1059 = vrot.lane.b32.xlu0 %v2447_v2, %s2403_s7 }
  0x33   :  { %2177 = vmatmul.mubr.msk.f32.gmra.mrb[14].mxu0 %vm43_vm1, %v37_v22 }
  0x34   :  { %2188 = vmatmul.mubr.msk.f32.gmra.mrb[14].mxu1 %vm43_vm1, %v37_v22  ;;  %192 = vmatprep.mubr.f32.mxu0 %v4040_v0  ;;  %v1530_v22 = vld [vmem:[%s4038_s2 + $0x140] sm:$0xff] }
  0x35   :  { %311 = vmatprep.mubr.f32.mxu1 %v4040_v0  ;;  %1065 = vrot.lane.b32.xlu1 %v2460_v5, %s2403_s7 }
  0x36   :  { %1063 = vrot.lane.b32.xlu0 %v2452_v3, %s2403_s7 }
  0x37   :  { %2178 = vmatmul.mubr.msk.f32.gmra.mrb[16].mxu0 %vm43_vm1, %v38_v23 }
  0x38   :  { %2189 = vmatmul.mubr.msk.f32.gmra.mrb[16].mxu1 %vm43_vm1, %v38_v23  ;;  %662 = vmatprep.mubr.f32.mxu0 %v4040_v0  ;;  %v1282_v23 = vld [vmem:[%s4038_s2 + $0xc0] sm:$0xf] }
  0x39   :  { %781 = vmatprep.mubr.f32.mxu1 %v4040_v0  ;;  %1087 = vrot.lane.b32.xlu1 %v2456_v4, %s2404_s10  ;;  %v2784_v0 = vld [vmem:[#allocation3 + $0x18] sm:$0xff] }
  0x3a   :  { %1085 = vrot.lane.b32.xlu0 %v2447_v2, %s2404_s10  ;;  %4114 = vst [vmem:[#allocation25_spill] sm:$0xff] %v2784_v0 }
  0x3d   :  { %1091 = vrot.lane.b32.xlu1 %v2460_v5, %s2404_s10 }
  0x3e   :  { %1089 = vrot.lane.b32.xlu0 %v2452_v3, %s2404_s10 }
  0x41   :  { %1113 = vrot.lane.b32.xlu1 %v2456_v4, %s2405_s11 }
  0x42   :  { %1111 = vrot.lane.b32.xlu0 %v2447_v2, %s2405_s11 }
  0x45   :  { %1117 = vrot.lane.b32.xlu1 %v2460_v5, %s2405_s11 }
  0x46   :  { %1115 = vrot.lane.b32.xlu0 %v2452_v3, %s2405_s11 }
  0x94   :  { %v2620_v60 = vpop.permute.xlu0 %530 }
  0x98   :  { %v2624_v61 = vpop.permute.xlu1 %1077 }
  0x99   :  { %4098 = vst [vmem:[#allocation9_spill] sm:$0xff] %v2624_v61  ;;  %v2626_v62 = vpop.permute.xlu0 %1051 }
  0x9a   :  { %4099 = vst [vmem:[#allocation10_spill] sm:$0xff] %v2626_v62 }
  0x9c   :  { %v2632_v63 = vpop.permute.xlu1 %1129 }
  0x9d   :  { %4100 = vst [vmem:[#allocation11_spill] sm:$0xff] %v2632_v63  ;;  %v2634_v1 = vpop.permute.xlu0 %1103 }
  0x9e   :  { %4101 = vst [vmem:[#allocation12_spill] sm:$0xff] %v2634_v1 }
  0xa0   :  { %v2638_v6 = vpop.permute.xlu1 %1165 }
  0xa1   :  { %4102 = vst [vmem:[#allocation13_spill] sm:$0xff] %v2638_v6  ;;  %v2640_v7 = vpop.permute.xlu0 %1139  ;;  %v2796_v6 = vld [vmem:[#allocation3 + $0x28] sm:$0xff] }
  0xa2   :  { %4103 = vst [vmem:[#allocation14_spill] sm:$0xff] %v2640_v7  ;;  %v2938_v7 = vld [vmem:[#allocation3 + $0x50] sm:$0xff] }
  0xa4   :  { %v2647_v8 = vpop.permute.xlu1 %1217 }
  0xa5   :  { %4104 = vst [vmem:[#allocation15_spill] sm:$0xff] %v2647_v8  ;;  %v2649_v9 = vpop.permute.xlu0 %1191  ;;  %v2798_v8 = vld [vmem:[#allocation3 + $0x68] sm:$0xff] }
  0xa6   :  { %4105 = vst [vmem:[#allocation16_spill] sm:$0xff] %v2649_v9  ;;  %v2794_v9 = vld [vmem:[#allocation3 + $0x10] sm:$0xff]  ;;  %4116 = vst [vmem:[#allocation27_spill] sm:$0xff] %v2798_v8 }
  0xa7   :  { %4115 = vst [vmem:[#allocation26_spill] sm:$0xff] %v2794_v9 }
  0xa8   :  { %v2656_v11 = vpop.permute.xlu1 %1035 }
  0xa9   :  { %v2654_v10 = vpop.permute.xlu0 %1033 }
  0xac   :  { %v2668_v13 = vpop.permute.xlu1 %1039 }
  0xad   :  { %v2666_v12 = vpop.permute.xlu0 %1037 }
  0xb0   :  { %v2676_v15 = vpop.permute.xlu1 %1061 }
  0xb1   :  { %v2674_v14 = vpop.permute.xlu0 %1059 }
  0xb4   :  { %v2689_v18 = vpop.permute.xlu1 %1065 }
  0xb5   :  { %v2687_v17 = vpop.permute.xlu0 %1063 }
  0xb8   :  { %v2697_v20 = vpop.permute.xlu1 %1087 }
  0xb9   :  { %v2695_v19 = vpop.permute.xlu0 %1085  ;;  %4107 = vst [vmem:[#allocation18_spill] sm:$0xff] %v2697_v20 }
  0xba   :  { %4106 = vst [vmem:[#allocation17_spill] sm:$0xff] %v2695_v19 }
  0xea   :  { %v146_v24 = vpop.f32.mrb[0].mxu0 }
  0xeb   :  { %v265_v25 = vpop.f32.mrb[0].mxu1  ;;  %318 = vrot.lane.b32.xlu0 %v146_v24, %s2402_s30  ;;  %v148_v27 = vpop.f32.mrb[1].mxu0 }
  0xec   :  { %v267_v26 = vpop.f32.mrb[1].mxu1  ;;  %322 = vrot.lane.b32.xlu1 %v265_v25, %s2402_s30  ;;  %v2714_v24 = vpop.permute.xlu0 %1089 }
  0xed   :  { %4108 = vst [vmem:[#allocation19_spill] sm:$0xff] %v2714_v24  ;;  %v2716_v25 = vpop.permute.xlu1 %1091  ;;  %v2824_v24 = vld [vmem:[#allocation3 + $0x48] sm:$0xff] }
  0xee   :  { %v152_v28 = vpop.f32.mrb[2].mxu0  ;;  %4109 = vst [vmem:[#allocation20_spill] sm:$0xff] %v2716_v25  ;;  %4120 = vst [vmem:[#allocation31_spill] sm:$0xff] %v2824_v24 }
  0xef   :  { %v271_v29 = vpop.f32.mrb[2].mxu1  ;;  %320 = vrot.lane.b32.xlu0 %v148_v27, %s2402_s30  ;;  %v154_v30 = vpop.f32.mrb[3].mxu0  ;;  %v1504_v27 = vld [vmem:[%s4038_s2 + $0x138] sm:$0xff] }
  0xf0   :  { %324 = vrot.lane.b32.xlu1 %v267_v26, %s2402_s30  ;;  %v273_v31 = vpop.f32.mrb[3].mxu1  ;;  %v1582_v26 = vld [vmem:[%s4038_s2 + $0x150] sm:$0xff] }
  0xf2   :  { %v158_v32 = vpop.f32.mrb[4].mxu0 }
  0xf3   :  { %v277_v33 = vpop.f32.mrb[4].mxu1  ;;  %341 = vrot.lane.b32.xlu0 %v152_v28, %s2403_s7  ;;  %v160_v34 = vpop.f32.mrb[5].mxu0 }
  0xf4   :  { %343 = vrot.lane.b32.xlu1 %v154_v30, %s2403_s7  ;;  %v279_v35 = vpop.f32.mrb[5].mxu1  ;;  %v2724_v28 = vpop.permute.xlu0 %1111  ;;  %v1618_v30 = vld [vmem:[%s4038_s2 + $0x160] sm:$0xff] }
  0xf5   :  { %4110 = vst [vmem:[#allocation21_spill] sm:$0xff] %v2724_v28 }
  0xf6   :  { %v164_v36 = vpop.f32.mrb[6].mxu0 }
  0xf7   :  { %v283_v37 = vpop.f32.mrb[6].mxu1  ;;  %345 = vrot.lane.b32.xlu0 %v271_v29, %s2403_s7  ;;  %v166_v38 = vpop.f32.mrb[7].mxu0 }
  0xf8   :  { %347 = vrot.lane.b32.xlu1 %v273_v31, %s2403_s7  ;;  %v285_v39 = vpop.f32.mrb[7].mxu1  ;;  %v2726_v29 = vpop.permute.xlu1 %1113  ;;  %v1556_v31 = vld [vmem:[%s4038_s2 + $0x148] sm:$0xff] }
  0xf9   :  { %4111 = vst [vmem:[#allocation22_spill] sm:$0xff] %v2726_v29 }
  0xfa   :  { %v2600_v40 = vpop.f32.mrb[8].mxu0 }
  0xfb   :  { %v2602_v41 = vpop.f32.mrb[8].mxu1  ;;  %363 = vrot.lane.b32.xlu0 %v158_v32, %s2404_s10  ;;  %v2606_v42 = vpop.f32.mrb[9].mxu0  ;;  %v1670_v32 = vld [vmem:[%s4038_s2 + $0x170] sm:$0xff] }
  0xfc   :  { %365 = vrot.lane.b32.xlu1 %v160_v34, %s2404_s10  ;;  %v2608_v43 = vpop.f32.mrb[9].mxu1  ;;  %v2740_v34 = vpop.permute.xlu0 %1115 }
  0xfd   :  { %4112 = vst [vmem:[#allocation23_spill] sm:$0xff] %v2740_v34 }
  0xfe   :  { %v176_v44 = vpop.f32.mrb[10].mxu0 }
  0xff   :  { %v295_v45 = vpop.f32.mrb[10].mxu1  ;;  %367 = vrot.lane.b32.xlu0 %v277_v33, %s2404_s10  ;;  %v178_v46 = vpop.f32.mrb[11].mxu0  ;;  %v1608_v33 = vld [vmem:[%s4038_s2 + $0x158] sm:$0xff] }
 0x100   :  { %369 = vrot.lane.b32.xlu1 %v279_v35, %s2404_s10  ;;  %v297_v47 = vpop.f32.mrb[11].mxu1  ;;  %v2742_v35 = vpop.permute.xlu1 %1117 }
 0x101   :  { %4113 = vst [vmem:[#allocation24_spill] sm:$0xff] %v2742_v35  ;;  %v2813_v35 = vld [vmem:[#allocation3 + $0x38] sm:$0xff] }
 0x102   :  { %v182_v48 = vpop.f32.mrb[12].mxu0  ;;  %4119 = vst [vmem:[#allocation30_spill] sm:$0xff] %v2813_v35 }
 0x103   :  { %v301_v49 = vpop.f32.mrb[12].mxu1  ;;  %385 = vrot.lane.b32.xlu0 %v164_v36, %s2405_s11  ;;  %v184_v50 = vpop.f32.mrb[13].mxu0  ;;  %v1644_v36 = vld [vmem:[%s4038_s2 + $0x168] sm:$0xff] }
 0x104   :  { %387 = vrot.lane.b32.xlu1 %v166_v38, %s2405_s11  ;;  %v303_v51 = vpop.f32.mrb[13].mxu1 }
 0x106   :  { %v188_v52 = vpop.f32.mrb[14].mxu0 }
 0x107   :  { %v307_v53 = vpop.f32.mrb[14].mxu1  ;;  %389 = vrot.lane.b32.xlu0 %v283_v37, %s2405_s11  ;;  %v190_v54 = vpop.f32.mrb[15].mxu0 }
 0x108   :  { %391 = vrot.lane.b32.xlu1 %v285_v39, %s2405_s11  ;;  %v309_v55 = vpop.f32.mrb[15].mxu1  ;;  %v1696_v39 = vld [vmem:[%s4038_s2 + $0x178] sm:$0xff] }
 0x10a   :  { %v194_v56 = vpop.f32.mrb[16].mxu0 }
 0x10b   :  { %v313_v57 = vpop.f32.mrb[16].mxu1  ;;  %407 = vrot.lane.b32.xlu0 %v176_v44, %s2406_s12  ;;  %v196_v58 = vpop.f32.mrb[17].mxu0 }
 0x10c   :  { %409 = vrot.lane.b32.xlu1 %v178_v46, %s2406_s12  ;;  %v315_v59 = vpop.f32.mrb[17].mxu1 }
 0x10f   :  { %411 = vrot.lane.b32.xlu0 %v295_v45, %s2406_s12 }
 0x110   :  { %413 = vrot.lane.b32.xlu1 %v297_v47, %s2406_s12 }
 0x113   :  { %429 = vrot.lane.b32.xlu0 %v182_v48, %s2407_s13 }
 0x114   :  { %431 = vrot.lane.b32.xlu1 %v184_v50, %s2407_s13 }
 0x117   :  { %433 = vrot.lane.b32.xlu0 %v301_v49, %s2407_s13 }
 0x118   :  { %435 = vrot.lane.b32.xlu1 %v303_v51, %s2407_s13 }
 0x11b   :  { %451 = vrot.lane.b32.xlu0 %v188_v52, %s2408_s14 }
 0x11c   :  { %453 = vrot.lane.b32.xlu1 %v190_v54, %s2408_s14 }
 0x11f   :  { %455 = vrot.lane.b32.xlu0 %v307_v53, %s2408_s14 }
 0x120   :  { %457 = vrot.lane.b32.xlu1 %v309_v55, %s2408_s14 }
 0x123   :  { %477 = vrot.lane.b32.xlu0 %v313_v57, %s2409_s15 }
 0x124   :  { %473 = vrot.lane.b32.xlu1 %v194_v56, %s2409_s15 }
 0x127   :  { %1147 = vrot.lane.b32.xlu0 %v2447_v2, %s2406_s12 }
 0x128   :  { %475 = vrot.lane.b32.xlu1 %v196_v58, %s2409_s15  ;;  %v326_v58 = vlaneseq }
 0x12b   :  { %1151 = vrot.lane.b32.xlu0 %v2452_v3, %s2406_s12 }
 0x12c   :  { %479 = vrot.lane.b32.xlu1 %v315_v59, %s2409_s15 }
 0x12f   :  { %1173 = vrot.lane.b32.xlu0 %v2447_v2, %s2407_s13 }
 0x130   :  { %1149 = vrot.lane.b32.xlu1 %v2456_v4, %s2406_s12 }
 0x133   :  { %1177 = vrot.lane.b32.xlu0 %v2452_v3, %s2407_s13 }
 0x134   :  { %1153 = vrot.lane.b32.xlu1 %v2460_v5, %s2406_s12 }
 0x137   :  { %1199 = vrot.lane.b32.xlu0 %v2447_v2, %s2408_s14 }
 0x138   :  { %1175 = vrot.lane.b32.xlu1 %v2456_v4, %s2407_s13 }
 0x13b   :  { %1203 = vrot.lane.b32.xlu0 %v2452_v3, %s2408_s14 }
 0x13c   :  { %1179 = vrot.lane.b32.xlu1 %v2460_v5, %s2407_s13 }
 0x13f   :  { %1243 = vperm.xlu0 %2241, %v1224_v16  }
 0x140   :  { %1201 = vrot.lane.b32.xlu1 %v2456_v4, %s2408_s14 }
 0x143   :  { %1227 = vrot.lane.b32.xlu0 %v2456_v4, %s2409_s15 }
 0x144   :  { %1205 = vrot.lane.b32.xlu1 %v2460_v5, %s2408_s14 }
 0x147   :  { %1231 = vrot.lane.b32.xlu0 %v2460_v5, %s2409_s15  ;;  %v2868_v5 = vld [vmem:[#allocation3 + $0xa8] sm:$0xff] }
 0x148   :  { %1225 = vrot.lane.b32.xlu1 %v2447_v2, %s2409_s15  ;;  %4126 = vst [vmem:[#allocation37_spill] sm:$0xff] %v2868_v5 }
 0x14b   :  { %1320 = vperm.xlu0 %2241, %v1317_v21   ;;  %v2754_v21 = vand.u32 127, %v326_v58  ;;  %v2782_v58 = vld [vmem:[#allocation3] sm:$0xff] }
 0x14c   :  { %1229 = vrot.lane.b32.xlu1 %v2452_v3, %s2409_s15  ;;  %v2888_v3 = vld [vmem:[#allocation3 + $0xc8] sm:$0xff] }
 0x14d   :  { %vm328_vm2 = vcmp.lt.s32.totalorder %v2754_v21, 17  ;;  %vm349_vm3 = vcmp.lt.s32.totalorder %v2754_v21, 16  ;;  %vm371_vm4 = vcmp.lt.s32.totalorder %v2754_v21, 15  ;;  %vm393_vm5 = vcmp.lt.s32.totalorder %v2754_v21, 1  ;;  %4129 = vst [vmem:[#allocation40_spill] sm:$0xff] %v2888_v3 }
 0x14e   :  { %vm415_vm6 = vcmp.lt.s32.totalorder %v2754_v21, 127  ;;  %vm437_vm7 = vcmp.lt.s32.totalorder %v2754_v21, 113  ;;  %vm459_vm8 = vcmp.lt.s32.totalorder %v2754_v21, 112  ;;  %vm481_vm9 = vcmp.lt.s32.totalorder %v2754_v21, 111 }
 0x14f   :  { %1549 = vperm.xlu0 %2241, %v1530_v22  }
 0x150   :  { %1285 = vperm.xlu1 %2242, %v1282_v23  }
 0x153   :  { %1601 = vperm.xlu0 %2241, %v1582_v26  }
 0x154   :  { %1523 = vperm.xlu1 %2242, %v1504_v27  }
 0x157   :  { %1637 = vperm.xlu0 %2241, %v1618_v30  }
 0x158   :  { %1575 = vperm.xlu1 %2242, %v1556_v31  }
 0x15b   :  { %1689 = vperm.xlu0 %2241, %v1670_v32  }
 0x15c   :  { %1611 = vperm.xlu1 %2242, %v1608_v33  }
 0x15d   :  { %v319_v38 = vpop.permute.xlu0 %318 }
 0x15e   :  { %v323_v37 = vpop.permute.xlu1 %322 }
 0x160   :  { %1663 = vperm.xlu1 %2242, %v1644_v36  }
 0x161   :  { %v321_v45 = vpop.permute.xlu0 %320 }
 0x162   :  { %v325_v44 = vpop.permute.xlu1 %324  ;;  %v330_v32 = vsel %vm328_vm2, %v321_v45, %v323_v37  ;;  %v331_v33 = vsel %vm328_vm2, %v319_v38, %v321_v45 }
 0x163   :  { %v329_v30 = vsel %vm328_vm2, %v323_v37, %v325_v44  ;;  %v332_v31 = vsel %vm328_vm2, %v325_v44, %v319_v38 }
 0x164   :  { %1715 = vperm.xlu1 %2242, %v1696_v39   ;;  %v2780_v39 = vld [vmem:[#allocation3 + $0x8] sm:$0xff]  ;;  %v2801_v63 = vmul.f32 %v2782_v58, %v332_v31  ;;  %v2804_v1 = vmul.f32 %v2784_v0, %v329_v30  ;;  %v2819_v31 = vmul.f32 %v2794_v9, %v330_v32  ;;  %v2838_v32 = vld [vmem:[#allocation3 + $0x40] sm:$0xff] }
 0x165   :  { %v342_v46 = vpop.permute.xlu0 %341  ;;  %v2816_v28 = vmul.f32 %v2780_v39, %v331_v33  ;;  %4121 = vst [vmem:[#allocation32_spill] sm:$0xff] %v2838_v32 }
 0x166   :  { %v344_v47 = vpop.permute.xlu1 %343 }
 0x167   :  { %v352_v44 = vsel %vm349_vm3, %v342_v46, %v344_v47 }
 0x168   :  { %v2827_v25 = vmul.f32 %v2796_v6, %v352_v44 }
 0x169   :  { %v346_v48 = vpop.permute.xlu0 %345 }
 0x16a   :  { %v348_v49 = vpop.permute.xlu1 %347  ;;  %v351_v37 = vsel %vm349_vm3, %v344_v47, %v346_v48 }
 0x16b   :  { %v350_v38 = vsel %vm349_vm3, %v346_v48, %v348_v49  ;;  %v353_v45 = vsel %vm349_vm3, %v348_v49, %v342_v46  ;;  %v2809_v46 = vld [vmem:[#allocation3 + $0x30] sm:$0xff]  ;;  %v2811_v49 = vld [vmem:[#allocation3 + $0x20] sm:$0xff] }
 0x16c   :  { %4117 = vst [vmem:[#allocation28_spill] sm:$0xff] %v2809_v46  ;;  %4118 = vst [vmem:[#allocation29_spill] sm:$0xff] %v2811_v49  ;;  %v2830_v19 = vmul.f32 %v2809_v46, %v351_v37  ;;  %v2833_v20 = vmul.f32 %v2811_v49, %v353_v45  ;;  %v2836_v33 = vmul.f32 %v2813_v35, %v350_v38  ;;  %v2851_v45 = vld [vmem:[#allocation3 + $0x70] sm:$0xff]  ;;  %v2864_v35 = vld [vmem:[#allocation3 + $0x60] sm:$0xff] }
 0x16d   :  { %v364_v50 = vpop.permute.xlu0 %363  ;;  %4123 = vst [vmem:[#allocation34_spill] sm:$0xff] %v2851_v45  ;;  %4125 = vst [vmem:[#allocation36_spill] sm:$0xff] %v2864_v35 }
 0x16e   :  { %v366_v51 = vpop.permute.xlu1 %365 }
 0x16f   :  { %v374_v47 = vsel %vm371_vm4, %v364_v50, %v366_v51 }
 0x171   :  { %v368_v52 = vpop.permute.xlu0 %367 }
 0x172   :  { %v370_v53 = vpop.permute.xlu1 %369 }
 0x173   :  { %v375_v30 = vsel %vm371_vm4, %v370_v53, %v364_v50  ;;  %v382_v50 = vmul.f32 %v2824_v24, %v374_v47  ;;  %v372_v38 = vsel %vm371_vm4, %v368_v52, %v370_v53  ;;  %v2874_v53 = vld [vmem:[#allocation3 + $0xc0] sm:$0xff] }
 0x174   :  { %v381_v61 = vmul.f32 %v2838_v32, %v375_v30  ;;  %4127 = vst [vmem:[#allocation38_spill] sm:$0xff] %v2874_v53  ;;  %v2882_v30 = vld [vmem:[#allocation3 + $0x78] sm:$0xff]  ;;  %v2886_v32 = vld [vmem:[#allocation3 + $0xb0] sm:$0xff] }
 0x175   :  { %v386_v54 = vpop.permute.xlu0 %385  ;;  %4128 = vst [vmem:[#allocation39_spill] sm:$0xff] %v2882_v30 }
 0x176   :  { %v388_v55 = vpop.permute.xlu1 %387 }
 0x177   :  { %v396_v36 = vsel %vm393_vm5, %v386_v54, %v388_v55 }
 0x178   :  { %v404_v29 = vmul.f32 %v2798_v8, %v396_v36  ;;  %v2843_v36 = vsel %vm371_vm4, %v366_v51, %v368_v52  ;;  %v2849_v8 = vld [vmem:[#allocation3 + $0xe0] sm:$0xff] }
 0x179   :  { %v390_v56 = vpop.permute.xlu0 %389  ;;  %4122 = vst [vmem:[#allocation33_spill] sm:$0xff] %v2849_v8  ;;  %v2858_v51 = vld [vmem:[#allocation3 + $0xa0] sm:$0xff] }
 0x17a   :  { %v392_v57 = vpop.permute.xlu1 %391  ;;  %v395_v44 = vsel %vm393_vm5, %v388_v55, %v390_v56  ;;  %4124 = vst [vmem:[#allocation35_spill] sm:$0xff] %v2858_v51  ;;  %v2866_v62 = vadd.f32 %v404_v29, %v382_v50 }
 0x17b   :  { %v397_v37 = vsel %vm393_vm5, %v392_v57, %v386_v54  ;;  %v394_v47 = vsel %vm393_vm5, %v390_v56, %v392_v57  ;;  %v405_v29 = vmul.f32 %v2851_v45, %v395_v44  ;;  %v2905_v45 = vld [vmem:[#allocation3 + $0xe8] sm:$0xff] }
 0x17c   :  { %v403_v50 = vmul.f32 %v2864_v35, %v397_v37  ;;  %v406_v0 = vmul.f32 %v2882_v30, %v394_v47 }
 0x17d   :  { %v2750_v59 = vpop.permute.xlu0 %407 }
 0x17e   :  { %v2752_v16 = vpop.permute.xlu1 %409 }
 0x17f   :  { %v418_v55 = vsel %vm415_vm6, %v2750_v59, %v2752_v16 }
 0x180   :  { %v425_v9 = vmul.f32 %v2858_v51, %v418_v55  ;;  %v2915_v51 = vld [vmem:[#allocation3 + $0xd0] sm:$0xff] }
 0x181   :  { %v2756_v22 = vpop.permute.xlu0 %411 }
 0x182   :  { %v2758_v23 = vpop.permute.xlu1 %413  ;;  %v417_v52 = vsel %vm415_vm6, %v2752_v16, %v2756_v22 }
 0x183   :  { %v416_v44 = vsel %vm415_vm6, %v2756_v22, %v2758_v23  ;;  %v419_v37 = vsel %vm415_vm6, %v2758_v23, %v2750_v59  ;;  %v426_v47 = vmul.f32 %v2868_v5, %v417_v52  ;;  %v2917_v22 = vld [vmem:[#allocation3 + $0xd8] sm:$0xff] }
 0x185   :  { %v2763_v26 = vpop.permute.xlu0 %429 }
 0x186   :  { %v2765_v27 = vpop.permute.xlu1 %431 }
 0x187   :  { %v440_v56 = vsel %vm437_vm7, %v2763_v26, %v2765_v27 }
 0x188   :  { %v447_v55 = vmul.f32 %v2874_v53, %v440_v56 }
 0x189   :  { %v434_v34 = vpop.permute.xlu0 %433 }
 0x18a   :  { %v436_v48 = vpop.permute.xlu1 %435  ;;  %v439_v16 = vsel %vm437_vm7, %v2765_v27, %v434_v34  ;;  %v2907_v27 = vld [vmem:[#allocation3 + $0xf0] sm:$0xff] }
 0x18b   :  { %v438_v30 = vsel %vm437_vm7, %v434_v34, %v436_v48  ;;  %v441_v59 = vsel %vm437_vm7, %v436_v48, %v2763_v26  ;;  %v448_v4 = vmul.f32 %v2888_v3, %v439_v16  ;;  %v427_v48 = vmul.f32 %v2886_v32, %v416_v44 }
 0x18c   :  { %v449_v3 = vmul.f32 %v2915_v51, %v438_v30  ;;  %v383_v44 = vmul.f32 %v2938_v7, %v2843_v36  ;;  %v2955_v36 = vld [vmem:[#allocation3 + $0x108] sm:$0xff] }
 0x18d   :  { %v452_v54 = vpop.permute.xlu0 %451 }
 0x18e   :  { %v454_v24 = vpop.permute.xlu1 %453 }
 0x18f   :  { %v462_v57 = vsel %vm459_vm8, %v452_v54, %v454_v24 }
 0x190   :  { %v469_v46 = vmul.f32 %v2849_v8, %v462_v57  ;;  %v2909_v57 = vld [vmem:[#allocation3 + $0xf8] sm:$0xff] }
 0x191   :  { %v2912_v8 = vld [vmem:[#allocation3 + $0xb8] sm:$0xff]  ;;  %v456_v23 = vpop.permute.xlu0 %455 }
 0x192   :  { %v458_v35 = vpop.permute.xlu1 %457  ;;  %v461_v52 = vsel %vm459_vm8, %v454_v24, %v456_v23  ;;  %v507_v53 = vadd.f32 %v469_v46, %v447_v55  ;;  %v428_v16 = vmul.f32 %v2912_v8, %v419_v37  ;;  %v450_v24 = vmul.f32 %v2917_v22, %v441_v59 }
 0x193   :  { %v460_v56 = vsel %vm459_vm8, %v456_v23, %v458_v35  ;;  %v463_v5 = vsel %vm459_vm8, %v458_v35, %v452_v54  ;;  %v470_v34 = vmul.f32 %v2905_v45, %v461_v52  ;;  %v2940_v23 = vld [vmem:[#allocation3 + $0x58] sm:$0xff]  ;;  %v499_v35 = vadd.f32 %v403_v50, %v381_v61 }
 0x194   :  { %v471_v49 = vmul.f32 %v2907_v27, %v460_v56  ;;  %v472_v26 = vmul.f32 %v2909_v57, %v463_v5  ;;  %v503_v46 = vadd.f32 %v425_v9, %v2600_v40  ;;  %v504_v54 = vadd.f32 %v426_v47, %v2606_v42 }
 0x195   :  { %v508_v55 = vadd.f32 %v470_v34, %v448_v4  ;;  %v478_v5 = vpop.permute.xlu0 %477  ;;  %v384_v37 = vmul.f32 %v2940_v23, %v372_v38  ;;  %v496_v59 = vadd.f32 %v2827_v25, %v2816_v28  ;;  %v495_v61 = vadd.f32 %v2833_v20, %v2801_v63  ;;  %v2953_v34 = vld [vmem:[#allocation3 + $0x100] sm:$0xff] }
 0x196   :  { %v474_v52 = vpop.permute.xlu1 %473  ;;  %v509_v30 = vadd.f32 %v471_v49, %v449_v3  ;;  %v510_v56 = vadd.f32 %v472_v26, %v450_v24  ;;  %v515_v50 = vadd.f32 %v507_v53, %v503_v46  ;;  %v501_v9 = vadd.f32 %v405_v29, %v383_v44  ;;  %v2972_v26 = vld [vmem:[#allocation3 + $0x118] sm:$0xff] }
 0x197   :  { %v516_v40 = vadd.f32 %v508_v55, %v504_v54  ;;  %v502_v42 = vadd.f32 %v406_v0, %v384_v37  ;;  %v505_v4 = vadd.f32 %v427_v48, %v2602_v41  ;;  %v506_v47 = vadd.f32 %v428_v16, %v2608_v43  ;;  %4131 = vst [vmem:[#allocation42_spill] sm:$0xff] %v2972_v26 }
 0x198   :  { %v497_v3 = vadd.f32 %v2830_v19, %v2819_v31  ;;  %v498_v25 = vadd.f32 %v2836_v33, %v2804_v1  ;;  %v512_v63 = vadd.f32 %v2866_v62, %v496_v59  ;;  %v511_v20 = vadd.f32 %v499_v35, %v495_v61  ;;  %v2970_v33 = vld [vmem:[#allocation3 + $0x110] sm:$0xff] }
 0x199   :  { %v2962_v49 = vpop.permute.xlu0 %1147  ;;  %v517_v0 = vadd.f32 %v509_v30, %v505_v4  ;;  %v518_v41 = vadd.f32 %v510_v56, %v506_v47  ;;  %4130 = vst [vmem:[#allocation41_spill] sm:$0xff] %v2970_v33  ;;  %v1043_v47 = vsel %vm328_vm2, %v2654_v10, %v2656_v11 }
 0x19a   :  { %v476_v28 = vpop.permute.xlu1 %475  ;;  %v519_v53 = vadd.f32 %v515_v50, %v511_v20  ;;  %v520_v29 = vadd.f32 %v516_v40, %v512_v63  ;;  %v513_v31 = vadd.f32 %v501_v9, %v497_v3  ;;  %v514_v62 = vadd.f32 %v502_v42, %v498_v25 }
 0x19b   :  { %v483_v43 = vsel %vm481_vm9, %v476_v28, %v478_v5  ;;  %v484_v38 = vsel %vm481_vm9, %v474_v52, %v476_v28  ;;  %v1044_v28 = vsel %vm328_vm2, %v2668_v13, %v2654_v10  ;;  %v1042_v10 = vsel %vm328_vm2, %v2656_v11, %v2666_v12 }
 0x19c   :  { %v491_v19 = vmul.f32 %v2953_v34, %v484_v38  ;;  %v492_v1 = vmul.f32 %v2955_v36, %v483_v43  ;;  %v521_v46 = vadd.f32 %v517_v0, %v513_v31  ;;  %v522_v54 = vadd.f32 %v518_v41, %v514_v62 }
 0x19d   :  { %v2974_v35 = vpop.permute.xlu0 %1151  ;;  %v1069_v0 = vsel %vm349_vm3, %v2674_v14, %v2676_v15  ;;  %v1070_v43 = vsel %vm349_vm3, %v2689_v18, %v2674_v14  ;;  %v1067_v11 = vsel %vm349_vm3, %v2687_v17, %v2689_v18  ;;  %v4137_v18 = vld [vmem:[#allocation28_spill] sm:$0xff] }
 0x19e   :  { %v523_v48 = vadd.f32 %v519_v53, %v491_v19  ;;  %v524_v16 = vadd.f32 %v520_v29, %v492_v1  ;;  %v480_v24 = vpop.permute.xlu1 %479  ;;  %v1041_v53 = vsel %vm328_vm2, %v2666_v12, %v2668_v13  ;;  %v1045_v19 = vmul.f32 %v1044_v28, %v2782_v58  ;;  %v4132_v12 = vld [vmem:[#allocation14_spill] sm:$0xff]  ;;  %v4134_v58 = vld [vmem:[#allocation7_spill] sm:$0xff]  ;;  %v4145_v28 = vld [vmem:[#allocation20_spill] sm:$0xff] }
 0x19f   :  { %v482_v55 = vsel %vm481_vm9, %v478_v5, %v480_v24  ;;  %v485_v44 = vsel %vm481_vm9, %v480_v24, %v474_v52  ;;  %v1072_v14 = vmul.f32 %v1069_v0, %v2796_v6  ;;  %v3045_v13 = vmul.f32 %v4132_v12, %v2447_v2  ;;  %v4136_v24 = vld [vmem:[#allocation25_spill] sm:$0xff] }
 0x1a0   :  { %v2981_v37 = vadd.f32 %v2620_v60, %v523_v48  ;;  %v493_v30 = vmul.f32 %v2970_v33, %v482_v55  ;;  %v494_v56 = vmul.f32 %v2972_v26, %v485_v44  ;;  %v2986_v59 = vadd.f32 %v2620_v60, %v524_v16  ;;  %v4135_v48 = vld [vmem:[#allocation26_spill] sm:$0xff]  ;;  %v4139_v44 = vld [vmem:[#allocation8_spill] sm:$0xff] }
 0x1a1   :  { %v2995_v4 = vpop.permute.xlu0 %1173  ;;  %v3050_v6 = vmul.f32 %v4132_v12, %v4134_v58  ;;  %v1047_v16 = vmul.f32 %v1042_v10, %v4135_v48  ;;  %v3061_v2 = vmul.f32 %v4132_v12, %v4139_v44  ;;  %v4151_v44 = vld [vmem:[#allocation32_spill] sm:$0xff] }
 0x1a2   :  { %v537_v61 = vsub.f32 0.0, %v2981_v37  ;;  %v525_v50 = vadd.f32 %v521_v46, %v493_v30  ;;  %v526_v40 = vadd.f32 %v522_v54, %v494_v56  ;;  %v2989_v9 = vpop.permute.xlu1 %1149  ;;  %v538_v5 = vsub.f32 0.0, %v2986_v59  ;;  %v4138_v54 = vld [vmem:[#allocation6_spill] sm:$0xff]  ;;  %v4153_v26 = vld [vmem:[#allocation36_spill] sm:$0xff] }
 0x1a3   :  { %v3057_v55 = vmul.f32 %v4132_v12, %v4138_v54  ;;  %v4140_v30 = vld [vmem:[#allocation10_spill] sm:$0xff] }
 0x1a4   :  { %v541_v42 = vmul.f32 1.442695, %v537_v61  ;;  %v2993_v52 = vadd.f32 %v2620_v60, %v525_v50  ;;  %v543_v3 = vmul.f32 1.442695, %v538_v5  ;;  %v3002_v25 = vadd.f32 %v2620_v60, %v526_v40  ;;  %v4141_v61 = vld [vmem:[#allocation30_spill] sm:$0xff]  ;;  %v4142_v5 = vld [vmem:[#allocation9_spill] sm:$0xff] }
 0x1a5   :  { %v1046_v60 = vmul.f32 %v1043_v47, %v2780_v39  ;;  %v1068_v39 = vsel %vm349_vm3, %v2676_v15, %v2687_v17  ;;  %v3039_v1 = vpop.permute.xlu0 %1177  ;;  %v4133_v15 = vld [vmem:[#allocation29_spill] sm:$0xff]  ;;  %v1048_v17 = vmul.f32 %v1041_v53, %v4136_v24  ;;  %v1074_v50 = vmul.f32 %v1067_v11, %v4141_v61  ;;  %v4143_v47 = vld [vmem:[#allocation18_spill] sm:$0xff] }
 0x1a6   :  { %2245 = vpow2.f32 %v541_v42  ;;  %v539_v63 = vsub.f32 0.0, %v2993_v52  ;;  %v3005_v20 = vpop.permute.xlu1 %1153  ;;  %v540_v41 = vsub.f32 0.0, %v3002_v25  ;;  %v1071_v62 = vmul.f32 %v1070_v43, %v4133_v15  ;;  %v4147_v53 = vld [vmem:[#allocation22_spill] sm:$0xff]  ;;  %v4149_v15 = vld [vmem:[#allocation24_spill] sm:$0xff] }
 0x1a7   :  { %2247 = vpow2.f32 %v543_v3  ;;  %v1073_v46 = vmul.f32 %v1068_v39, %v4137_v18  ;;  %v1055_v56 = vmul.f32 %v4140_v30, %v1046_v60  ;;  %v1054_v40 = vmul.f32 %v4140_v30, %v1045_v19  ;;  %v4144_v3 = vld [vmem:[#allocation17_spill] sm:$0xff]  ;;  %v4146_v60 = vld [vmem:[#allocation19_spill] sm:$0xff] }
 0x1a8   :  { %v545_v38 = vmul.f32 1.442695, %v539_v63  ;;  %v547_v29 = vmul.f32 1.442695, %v540_v41  ;;  %v1081_v42 = vmul.f32 %v4142_v5, %v1072_v14  ;;  %v1095_v63 = vsel %vm371_vm4, %v4144_v3, %v4143_v47  ;;  %v4148_v39 = vld [vmem:[#allocation21_spill] sm:$0xff]  ;;  %v4150_v18 = vld [vmem:[#allocation31_spill] sm:$0xff] }
 0x1a9   :  { %v1096_v0 = vsel %vm371_vm4, %v4145_v28, %v4144_v3  ;;  %v1080_v43 = vmul.f32 %v4142_v5, %v1071_v62  ;;  %v1093_v10 = vsel %vm371_vm4, %v4146_v60, %v4145_v28  ;;  %v1056_v14 = vmul.f32 %v4140_v30, %v1047_v16  ;;  %v1200_v58 = vpop.permute.xlu0 %1199 }
 0x1aa   :  { %2249 = vpow2.f32 %v545_v38  ;;  %v3041_v31 = vpop.permute.xlu1 %1175  ;;  %v1094_v38 = vsel %vm371_vm4, %v4143_v47, %v4146_v60  ;;  %v1057_v11 = vmul.f32 %v4140_v30, %v1048_v17  ;;  %v1082_v12 = vmul.f32 %v4142_v5, %v1073_v46  ;;  %v4152_v30 = vld [vmem:[#allocation27_spill] sm:$0xff] }
 0x1ab   :  { %2251 = vpow2.f32 %v547_v29  ;;  %v1121_v29 = vsel %vm393_vm5, %v4148_v39, %v4147_v53  ;;  %v1122_v62 = vsel %vm393_vm5, %v4149_v15, %v4148_v39  ;;  %v1083_v24 = vmul.f32 %v4142_v5, %v1074_v50 }
 0x1ac   :  { %v1098_v54 = vmul.f32 %v1095_v63, %v4150_v18  ;;  %v1097_v61 = vmul.f32 %v1096_v0, %v4151_v44  ;;  %v1099_v16 = vmul.f32 %v1094_v38, %v2938_v7  ;;  %v1100_v17 = vmul.f32 %v1093_v10, %v2940_v23  ;;  %v4154_v63 = vld [vmem:[#allocation23_spill] sm:$0xff] }
 0x1ad   :  { %v1124_v46 = vmul.f32 %v1121_v29, %v4152_v30  ;;  %v3101_v60 = vadd.f32 %v1081_v42, %v1055_v56  ;;  %v3103_v39 = vadd.f32 %v1080_v43, %v1054_v40  ;;  %v1123_v33 = vmul.f32 %v1122_v62, %v4153_v26  ;;  %v4155_v42 = vld [vmem:[#allocation12_spill] sm:$0xff] }
 0x1ae   :  { %v1180_v41 = vpop.permute.xlu1 %1179  ;;  %v3106_v5 = vadd.f32 %v1082_v12, %v1056_v14  ;;  %v1120_v7 = vsel %vm393_vm5, %v4147_v53, %v4154_v63  ;;  %v1119_v23 = vsel %vm393_vm5, %v4154_v63, %v4149_v15  ;;  %v3116_v40 = vadd.f32 %v1083_v24, %v1057_v11  ;;  %v4156_v53 = vld [vmem:[#allocation11_spill] sm:$0xff]  ;;  %v4157_v15 = vld [vmem:[#allocation34_spill] sm:$0xff] }
 0x1af   :  { %v1107_v26 = vmul.f32 %v4155_v42, %v1098_v54  ;;  %v3120_v0 = vmul.f32 %v4155_v42, %v1097_v61  ;;  %v1108_v38 = vmul.f32 %v4155_v42, %v1099_v16  ;;  %v3124_v10 = vmul.f32 %v4155_v42, %v1100_v17  ;;  %v4158_v11 = vld [vmem:[#allocation39_spill] sm:$0xff] }
 0x1b0   :  { %v2246_v19 = vpop.eup %2245  ;;  %v1133_v29 = vmul.f32 %v4156_v53, %v1124_v46  ;;  %v1125_v62 = vmul.f32 %v1120_v7, %v4157_v15  ;;  %v3130_v24 = vmul.f32 %v4156_v53, %v1123_v33  ;;  %v1156_v18 = vsel %vm415_vm6, %v2989_v9, %v2974_v35  ;;  %v4159_v46 = vld [vmem:[#allocation33_spill] sm:$0xff] }
 0x1b1   :  { %v2248_v48 = vpop.eup %2247  ;;  %v549_v47 = vadd.f32 1.0, %v2246_v19  ;;  %v1204_v19 = vpop.permute.xlu0 %1203  ;;  %v1157_v33 = vsel %vm415_vm6, %v2962_v49, %v2989_v9  ;;  %v1158_v17 = vsel %vm415_vm6, %v3005_v20, %v2962_v49  ;;  %v1181_v9 = vsel %vm437_vm7, %v3039_v1, %v1180_v41 }
 0x1b2   :  { %v1202_v3 = vpop.permute.xlu1 %1201  ;;  %v550_v28 = vadd.f32 1.0, %v2248_v48  ;;  %v1126_v48 = vmul.f32 %v1119_v23, %v4158_v11  ;;  %v1182_v30 = vsel %vm437_vm7, %v3041_v31, %v3039_v1  ;;  %v1187_v1 = vmul.f32 %v1181_v9, %v2915_v51 }
 0x1b3   :  { %2253 = vrcp.f32 %v549_v47  ;;  %v1209_v54 = vsel %vm459_vm8, %v1200_v58, %v1202_v3  ;;  %v1155_v47 = vsel %vm415_vm6, %v2974_v35, %v3005_v20  ;;  %v1208_v16 = vsel %vm459_vm8, %v1202_v3, %v1204_v19 }
 0x1b4   :  { %v2250_v50 = vpop.eup %2249  ;;  %2255 = vrcp.f32 %v550_v28  ;;  %v1184_v35 = vsel %vm437_vm7, %v1180_v41, %v2995_v4  ;;  %v1211_v49 = vmul.f32 %v1209_v54, %v4159_v46  ;;  %v1134_v28 = vmul.f32 %v4156_v53, %v1125_v62 }
 0x1b5   :  { %v2252_v56 = vpop.eup %2251  ;;  %v551_v43 = vadd.f32 1.0, %v2250_v50  ;;  %v4160_v50 = vld [vmem:[#allocation35_spill] sm:$0xff]  ;;  %v1161_v7 = vmul.f32 %v1155_v47, %v2886_v32  ;;  %v1212_v23 = vmul.f32 %v1208_v16, %v2905_v45  ;;  %v1162_v41 = vmul.f32 %v1158_v17, %v2912_v8 }
 0x1b6   :  { %v1206_v14 = vpop.permute.xlu1 %1205  ;;  %v552_v12 = vadd.f32 1.0, %v2252_v56  ;;  %v1159_v63 = vmul.f32 %v1157_v33, %v4160_v50  ;;  %v4161_v56 = vld [vmem:[#allocation38_spill] sm:$0xff]  ;;  %v4164_v45 = vld [vmem:[#allocation15_spill] sm:$0xff]  ;;  %v4166_v33 = vld [vmem:[#allocation16_spill] sm:$0xff]  ;;  %v1255_v17 = vadd.f32 %v1133_v29, %v1107_v26 }
 0x1b7   :  { %2257 = vrcp.f32 %v551_v43  ;;  %v1207_v44 = vsel %vm459_vm8, %v1204_v19, %v1206_v14  ;;  %v1210_v61 = vsel %vm459_vm8, %v1206_v14, %v1200_v58  ;;  %v1183_v58 = vsel %vm437_vm7, %v2995_v4, %v3041_v31  ;;  %v4162_v19 = vld [vmem:[#allocation37_spill] sm:$0xff] }
 0x1b8   :  { %2259 = vrcp.f32 %v552_v12  ;;  %v1213_v20 = vmul.f32 %v1207_v44, %v2907_v27  ;;  %v1214_v3 = vmul.f32 %v1210_v61, %v2909_v57  ;;  %v1185_v42 = vmul.f32 %v1183_v58, %v4161_v56  ;;  %v4163_v12 = vld [vmem:[#allocation40_spill] sm:$0xff] }
 0x1b9   :  { %v1188_v31 = vmul.f32 %v1184_v35, %v2917_v22  ;;  %v1135_v57 = vmul.f32 %v4156_v53, %v1126_v48  ;;  %v1160_v14 = vmul.f32 %v1156_v18, %v4162_v19  ;;  %v1186_v15 = vmul.f32 %v1182_v30, %v4163_v12  ;;  %v4165_v22 = vld [vmem:[#allocation13_spill] sm:$0xff] }
 0x1ba   :  { %v1226_v27 = vpop.permute.xlu1 %1225  ;;  %v1220_v62 = vmul.f32 %v4164_v45, %v1211_v49  ;;  %v1222_v8 = vmul.f32 %v4164_v45, %v1213_v20  ;;  %v1223_v11 = vmul.f32 %v4164_v45, %v1214_v3  ;;  %v1168_v44 = vmul.f32 %v4165_v22, %v1159_v63 }
 0x1bb   :  { %v1170_v53 = vmul.f32 %v4165_v22, %v1161_v7  ;;  %v1221_v48 = vmul.f32 %v4164_v45, %v1212_v23  ;;  %v1171_v61 = vmul.f32 %v4165_v22, %v1162_v41  ;;  %v1194_v47 = vmul.f32 %v4166_v33, %v1185_v42  ;;  %v562_v23 = vld [vmem:[%s4038_s2 + $0x50] sm:$0xff] }
 0x1bc   :  { %v1196_v16 = vmul.f32 %v4166_v33, %v1187_v1  ;;  %v1256_v58 = vadd.f32 %v1134_v28, %v1108_v38  ;;  %v1169_v9 = vmul.f32 %v4165_v22, %v1160_v14  ;;  %v1195_v35 = vmul.f32 %v4166_v33, %v1186_v15 }
 0x1bd   :  { %v2254_v4 = vpop.eup %2253  ;;  %v1262_v46 = vadd.f32 %v1220_v62, %v1194_v47  ;;  %v4167_v28 = vmov 0.0   ;;  %v1260_v41 = vadd.f32 %v1170_v53, %v3057_v55  ;;  %v1261_v56 = vadd.f32 %v1171_v61, %v3061_v2 }
 0x1be   :  { %v2256_v43 = vpop.eup %2255  ;;  %v557_v32 = vmul.f32 %v2254_v4, %v2981_v37  ;;  %v3188_v54 = vpop.permute.xlu0 %1243  ;;  %v561_v37 = vld [vmem:[%s4038_s2 + $0x48] sm:$0xff]  ;;  %v1264_v49 = vadd.f32 %v1222_v8, %v1196_v16  ;;  %v1263_v7 = vadd.f32 %v1221_v48, %v1195_v35  ;;  %v1257_v4 = vadd.f32 %v1135_v57, %v3124_v10  ;;  %v4169_v57 = vld [vmem:[#allocation42_spill] sm:$0xff] }
 0x1bf   :  { %v558_v51 = vmul.f32 %v2256_v43, %v2986_v59  ;;  %v1197_v59 = vmul.f32 %v4166_v33, %v1188_v31  ;;  %v1230_v3 = vpop.permute.xlu1 %1229  ;;  %v1254_v42 = vadd.f32 %v3130_v24, %v3120_v0  ;;  %v1259_v1 = vadd.f32 %v1169_v9, %v3050_v6  ;;  %v4168_v0 = vld [vmem:[#allocation41_spill] sm:$0xff]  ;;  %v565_v33 = vld [vmem:[%s4038_s2 + $0x68] sm:$0xff] }
 0x1c0   :  { %v1272_v19 = vadd.f32 %v1264_v49, %v1260_v41  ;;  %v1269_v6 = vadd.f32 %v1257_v4, %v3116_v40  ;;  %v567_v49 = vld [vmem:[%s4038_s2 + $0x78] sm:$0xff] }
 0x1c1   :  { %v2258_v18 = vpop.eup %2257  ;;  %598 = vmatprep.subr.mxu0 %v558_v51  ;;  %v1265_v20 = vadd.f32 %v1223_v11, %v1197_v59  ;;  %v1266_v15 = vadd.f32 %v1254_v42, %v3103_v39 }
 0x1c2   :  { %599 = vmatpush1.msra.mxu0 %v557_v32  ;;  %v2260_v30 = vpop.eup %2259  ;;  %v1228_v50 = vpop.permute.xlu0 %1227  ;;  %v559_v63 = vmul.f32 %v2258_v18, %v2993_v52  ;;  %v1258_v52 = vadd.f32 %v1168_v44, %v3045_v13  ;;  %v1271_v13 = vadd.f32 %v1263_v7, %v1259_v1 }
 0x1c3   :  { %2190 = vmatmul.mubr.msk.f32.vlgmr.msra.gmra.mrb[18].mxu0 %vm570_vm10, %v561_v37  ;;  %v1234_v26 = vsel %vm481_vm9, %v1228_v50, %v1230_v3  ;;  %v1235_v38 = vsel %vm481_vm9, %v1226_v27, %v1228_v50  ;;  %v560_v29 = vmul.f32 %v2260_v30, %v3002_v25  ;;  %v1273_v14 = vadd.f32 %v1265_v20, %v1261_v56  ;;  %v568_v20 = vld [vmem:[%s4038_s2 + $0x80] sm:$0xff]  ;;  %v569_v50 = vld [vmem:[%s4038_s2 + $0x88] sm:$0xff] }
 0x1c4   :  { %668 = vmatprep.mubr.f32.mxu0 %v4167_v28  ;;  %v1237_v25 = vmul.f32 %v1235_v38, %v2953_v34  ;;  %v1238_v31 = vmul.f32 %v1234_v26, %v2955_v36  ;;  %v1270_v43 = vadd.f32 %v1262_v46, %v1258_v52  ;;  %v563_v34 = vld [vmem:[%s4038_s2 + $0x58] sm:$0xff]  ;;  %v1268_v36 = vadd.f32 %v1256_v58, %v3106_v5  ;;  %v566_v58 = vld [vmem:[%s4038_s2 + $0x70] sm:$0xff] }
 0x1c5   :  { %717 = vmatprep.subr.mxu1 %v560_v29  ;;  %v1277_v40 = vadd.f32 %v1273_v14, %v1269_v6 }
 0x1c6   :  { %718 = vmatpush1.msra.mxu1 %v559_v63  ;;  %v1232_v10 = vpop.permute.xlu0 %1231  ;;  %v1246_v32 = vmul.f32 %v3188_v54, %v1237_v25  ;;  %v1247_v45 = vmul.f32 %v3188_v54, %v1238_v31  ;;  %v1276_v8 = vadd.f32 %v1272_v19, %v1268_v36  ;;  %v1274_v11 = vadd.f32 %v1270_v43, %v1266_v15  ;;  %v1316_v43 = vld [vmem:[%s4038_s2 + $0x90] sm:$0xff] }
 0x1c7   :  { %2191 = vmatmul.mubr.msk.f32.gmra.mrb[20].mxu0 %vm570_vm10, %v562_v23  ;;  %v1233_v55 = vsel %vm481_vm9, %v1230_v3, %v1232_v10  ;;  %v1236_v2 = vsel %vm481_vm9, %v1232_v10, %v1226_v27  ;;  %2199 = vmatmul.mubr.msk.f32.vlgmr.msra.gmra.mrb[18].mxu1 %vm570_vm10, %v561_v37  ;;  %v1267_v27 = vadd.f32 %v1255_v17, %v3101_v60  ;;  %v564_v60 = vld [vmem:[%s4038_s2 + $0x60] sm:$0xff] }
 0x1c8   :  { %674 = vmatprep.mubr.f32.mxu0 %v4167_v28  ;;  %v1239_v24 = vmul.f32 %v1233_v55, %v4168_v0  ;;  %v1240_v12 = vmul.f32 %v1236_v2, %v4169_v57  ;;  %787 = vmatprep.mubr.f32.mxu1 %v4167_v28  ;;  %v1278_v44 = vadd.f32 %v1274_v11, %v1246_v32 }
 0x1c9   :  { %v1275_v51 = vadd.f32 %v1271_v13, %v1267_v27 }
 0x1ca   :  { %v1248_v62 = vmul.f32 %v3188_v54, %v1239_v24  ;;  %v1249_v5 = vmul.f32 %v3188_v54, %v1240_v12 }
 0x1cb   :  { %2192 = vmatmul.mubr.msk.f32.gmra.mrb[22].mxu0 %vm570_vm10, %v563_v34  ;;  %2200 = vmatmul.mubr.msk.f32.gmra.mrb[20].mxu1 %vm570_vm10, %v562_v23  ;;  %v1279_v54 = vadd.f32 %v1275_v51, %v1247_v45 }
 0x1cc   :  { %680 = vmatprep.mubr.f32.mxu0 %v4167_v28  ;;  %v1280_v39 = vadd.f32 %v1276_v8, %v1248_v62  ;;  %v1281_v22 = vadd.f32 %v1277_v40, %v1249_v5  ;;  %793 = vmatprep.mubr.f32.mxu1 %v4167_v28 }
 0x1cf   :  { %v1286_v53 = vpop.permute.xlu1 %1285  ;;  %2193 = vmatmul.mubr.msk.f32.gmra.mrb[24].mxu0 %vm570_vm10, %v564_v60  ;;  %2201 = vmatmul.mubr.msk.f32.gmra.mrb[22].mxu1 %vm570_vm10, %v563_v34 }
 0x1d0   :  { %v1288_v48 = vadd.f32 %v1286_v53, %v1278_v44  ;;  %v1289_v37 = vadd.f32 %v1286_v53, %v1279_v54  ;;  %v1290_v18 = vadd.f32 %v1286_v53, %v1280_v39  ;;  %v3252_v61 = vadd.f32 %v1286_v53, %v1281_v22  ;;  %799 = vmatprep.mubr.f32.mxu1 %v4167_v28 }
 0x1d1   :  { %686 = vmatprep.mubr.f32.mxu0 %v4167_v28 }
 0x1d2   :  { %v1292_v47 = vsub.f32 0.0, %v1288_v48  ;;  %v1293_v16 = vsub.f32 0.0, %v1289_v37  ;;  %v1294_v59 = vsub.f32 0.0, %v1290_v18  ;;  %v1295_v17 = vsub.f32 0.0, %v3252_v61 }
 0x1d3   :  { %2194 = vmatmul.mubr.msk.f32.gmra.mrb[26].mxu0 %vm570_vm10, %v565_v33  ;;  %2202 = vmatmul.mubr.msk.f32.gmra.mrb[24].mxu1 %vm570_vm10, %v564_v60 }
 0x1d4   :  { %v1296_v9 = vmul.f32 1.442695, %v1292_v47  ;;  %v1298_v35 = vmul.f32 1.442695, %v1293_v16  ;;  %v1300_v30 = vmul.f32 1.442695, %v1294_v59  ;;  %692 = vmatprep.mubr.f32.mxu0 %v4167_v28  ;;  %805 = vmatprep.mubr.f32.mxu1 %v4167_v28 }
 0x1d5   :  { %v1302_v46 = vmul.f32 1.442695, %v1295_v17  ;;  %v1321_v17 = vpop.permute.xlu0 %1320 }
 0x1d6   :  { %2261 = vpow2.f32 %v1296_v9 }
 0x1d7   :  { %2263 = vpow2.f32 %v1298_v35  ;;  %2195 = vmatmul.mubr.msk.f32.gmra.mrb[28].mxu0 %vm570_vm10, %v566_v58  ;;  %2203 = vmatmul.mubr.msk.f32.gmra.mrb[26].mxu1 %vm570_vm10, %v565_v33 }
 0x1d8   :  { %2265 = vpow2.f32 %v1300_v30  ;;  %698 = vmatprep.mubr.f32.mxu0 %v4167_v28  ;;  %811 = vmatprep.mubr.f32.mxu1 %v4167_v28 }
 0x1d9   :  { %2267 = vpow2.f32 %v1302_v46 }
 0x1db   :  { %2196 = vmatmul.mubr.msk.f32.gmra.mrb[30].mxu0 %vm570_vm10, %v567_v49  ;;  %2204 = vmatmul.mubr.msk.f32.gmra.mrb[28].mxu1 %vm570_vm10, %v566_v58 }
 0x1dc   :  { %704 = vmatprep.mubr.f32.mxu0 %v4167_v28  ;;  %817 = vmatprep.mubr.f32.mxu1 %v4167_v28 }
 0x1df   :  { %2197 = vmatmul.mubr.msk.f32.gmra.mrb[32].mxu0 %vm570_vm10, %v568_v20  ;;  %2205 = vmatmul.mubr.msk.f32.gmra.mrb[30].mxu1 %vm570_vm10, %v567_v49 }
 0x1e0   :  { %v2262_v3 = vpop.eup %2261  ;;  %710 = vmatprep.mubr.f32.mxu0 %v4167_v28  ;;  %823 = vmatprep.mubr.f32.mxu1 %v4167_v28 }
 0x1e1   :  { %v2264_v63 = vpop.eup %2263  ;;  %v1304_v7 = vadd.f32 1.0, %v2262_v3 }
 0x1e2   :  { %v2266_v26 = vpop.eup %2265  ;;  %v1305_v38 = vadd.f32 1.0, %v2264_v63 }
 0x1e3   :  { %v2268_v29 = vpop.eup %2267  ;;  %v1306_v23 = vadd.f32 1.0, %v2266_v26  ;;  %2269 = vrcp.f32 %v1304_v7  ;;  %2198 = vmatmul.mubr.msk.f32.gmra.mrb[34].mxu0 %vm570_vm10, %v569_v50  ;;  %2206 = vmatmul.mubr.msk.f32.gmra.mrb[32].mxu1 %vm570_vm10, %v568_v20 }
 0x1e4   :  { %v1307_v4 = vadd.f32 1.0, %v2268_v29  ;;  %2271 = vrcp.f32 %v1305_v38  ;;  %1402 = vmatprep.mubr.f32.mxu0 %v4167_v28  ;;  %829 = vmatprep.mubr.f32.mxu1 %v4167_v28 }
 0x1e5   :  { %2273 = vrcp.f32 %v1306_v23 }
 0x1e6   :  { %2275 = vrcp.f32 %v1307_v4 }
 0x1e7   :  { %2207 = vmatmul.mubr.msk.f32.gmra.mrb[34].mxu1 %vm570_vm10, %v569_v50 }
 0x1e8   :  { %1473 = vmatprep.mubr.f32.mxu1 %v4167_v28 }
 0x1ed   :  { %v2270_v52 = vpop.eup %2269 }
 0x1ee   :  { %v2272_v41 = vpop.eup %2271  ;;  %v1312_v56 = vmul.f32 %v2270_v52, %v1288_v48 }
 0x1ef   :  { %v2274_v42 = vpop.eup %2273  ;;  %v1313_v1 = vmul.f32 %v2272_v41, %v1289_v37 }
 0x1f0   :  { %v2276_v25 = vpop.eup %2275  ;;  %v1314_v31 = vmul.f32 %v2274_v42, %v1290_v18 }
 0x1f1   :  { %2208 = vmatprep.subr.msk.mxu0 %vm71_vm0, %v1313_v1  ;;  %v1315_v19 = vmul.f32 %v2276_v25, %v3252_v61 }
 0x1f2   :  { %2209 = vmatpush1.msk.msra.mxu0 %vm71_vm0, %v1312_v56 }
 0x1f3   :  { %2211 = vmatprep.subr.msk.mxu1 %vm71_vm0, %v1315_v19  ;;  %2210 = vmatmul.mubr.msk.f32.vlgmr.msra.gmra.mrb[36].mxu0 %vm43_vm1, %v1316_v43 }
 0x1f4   :  { %2212 = vmatpush1.msk.msra.mxu1 %vm71_vm0, %v1314_v31  ;;  %1862 = vmatprep.mubr.f32.mxu0 %v4167_v28 }
 0x1f5   :  { %2213 = vmatmul.mubr.msk.f32.vlgmr.msra.gmra.mrb[36].mxu1 %vm43_vm1, %v1316_v43 }
 0x1f6   :  { %1933 = vmatprep.mubr.f32.mxu1 %v4167_v28 }
 0x296   :  { %v3307_v14 = vpop.f32.mrb[18].mxu0 }
 0x297   :  { %v3309_v10 = vpop.f32.mrb[19].mxu0 }
 0x29a   :  { %v3311_v13 = vpop.f32.mrb[20].mxu0  ;;  %v3313_v55 = vpop.f32.mrb[18].mxu1 }
 0x29b   :  { %v3315_v2 = vpop.f32.mrb[21].mxu0  ;;  %v3317_v34 = vpop.f32.mrb[19].mxu1 }
 0x29e   :  { %v3319_v36 = vpop.f32.mrb[22].mxu0  ;;  %v3321_v6 = vpop.f32.mrb[20].mxu1 }
 0x29f   :  { %v3323_v0 = vpop.f32.mrb[23].mxu0  ;;  %v3325_v24 = vpop.f32.mrb[21].mxu1 }
 0x2a2   :  { %v3327_v57 = vpop.f32.mrb[24].mxu0  ;;  %v3329_v12 = vpop.f32.mrb[22].mxu1 }
 0x2a3   :  { %v3331_v27 = vpop.f32.mrb[25].mxu0  ;;  %v3333_v15 = vpop.f32.mrb[23].mxu1 }
 0x2a6   :  { %v3335_v32 = vpop.f32.mrb[26].mxu0  ;;  %v3337_v45 = vpop.f32.mrb[24].mxu1 }
 0x2a7   :  { %4170 = vst [vmem:[#allocation14_spill] sm:$0xff] %v3335_v32  ;;  %v3339_v62 = vpop.f32.mrb[27].mxu0  ;;  %v3341_v5 = vpop.f32.mrb[25].mxu1 }
 0x2a8   :  { %4171 = vst [vmem:[#allocation29_spill] sm:$0xff] %v3339_v62 }
 0x2aa   :  { %v3343_v8 = vpop.f32.mrb[28].mxu0  ;;  %v3345_v40 = vpop.f32.mrb[26].mxu1 }
 0x2ab   :  { %4172 = vst [vmem:[#allocation7_spill] sm:$0xff] %v3345_v40  ;;  %v3347_v11 = vpop.f32.mrb[29].mxu0  ;;  %v3349_v51 = vpop.f32.mrb[27].mxu1  ;;  %v3717_v40 = vld [vmem:[#allocation3 + $0xb0] sm:$0xff] }
 0x2ac   :  { %4173 = vst [vmem:[#allocation26_spill] sm:$0xff] %v3349_v51  ;;  %4178 = vst [vmem:[#allocation10_spill] sm:$0xff] %v3717_v40 }
 0x2ae   :  { %v3351_v60 = vpop.f32.mrb[30].mxu0  ;;  %v3353_v39 = vpop.f32.mrb[28].mxu1 }
 0x2af   :  { %v3355_v22 = vpop.f32.mrb[31].mxu0  ;;  %v3357_v44 = vpop.f32.mrb[29].mxu1 }
 0x2b2   :  { %v3359_v54 = vpop.f32.mrb[32].mxu0  ;;  %v3361_v53 = vpop.f32.mrb[30].mxu1 }
 0x2b3   :  { %v3363_v48 = vpop.f32.mrb[33].mxu0  ;;  %v3365_v37 = vpop.f32.mrb[31].mxu1 }
 0x2b6   :  { %v3367_v18 = vpop.f32.mrb[34].mxu0  ;;  %v3369_v61 = vpop.f32.mrb[32].mxu1 }
 0x2b7   :  { %v3371_v33 = vpop.f32.mrb[35].mxu0  ;;  %v3373_v47 = vpop.f32.mrb[33].mxu1 }
 0x2ba   :  { %v3375_v16 = vpop.f32.mrb[34].mxu1 }
 0x2bb   :  { %v3377_v59 = vpop.f32.mrb[35].mxu1 }
 0x2c6   :  { %v1404_v58 = vpop.f32.mrb[36].mxu0 }
 0x2c7   :  { %v1405_v9 = vadd.f32 %v1404_v58, %v1321_v17  ;;  %v1406_v35 = vpop.f32.mrb[37].mxu0 }
 0x2c8   :  { %v1475_v30 = vpop.f32.mrb[36].mxu1  ;;  %v1407_v46 = vadd.f32 %v1406_v35, %v1321_v17 }
 0x2c9   :  { %v1480_v49 = vsub.f32 0.0, %v1405_v9  ;;  %v1476_v20 = vadd.f32 %v1475_v30, %v1321_v17  ;;  %v1477_v3 = vpop.f32.mrb[37].mxu1 }
 0x2ca   :  { %v1481_v50 = vsub.f32 0.0, %v1407_v46  ;;  %v1478_v63 = vadd.f32 %v1477_v3, %v1321_v17 }
 0x2cb   :  { %v1484_v7 = vmul.f32 1.442695, %v1480_v49  ;;  %v1482_v26 = vsub.f32 0.0, %v1476_v20 }
 0x2cc   :  { %v1486_v38 = vmul.f32 1.442695, %v1481_v50  ;;  %v1483_v29 = vsub.f32 0.0, %v1478_v63 }
 0x2cd   :  { %2277 = vpow2.f32 %v1484_v7  ;;  %v1488_v23 = vmul.f32 1.442695, %v1482_v26 }
 0x2ce   :  { %2279 = vpow2.f32 %v1486_v38  ;;  %v1490_v4 = vmul.f32 1.442695, %v1483_v29 }
 0x2cf   :  { %2281 = vpow2.f32 %v1488_v23 }
 0x2d0   :  { %2283 = vpow2.f32 %v1490_v4 }
 0x2d7   :  { %v2278_v52 = vpop.eup %2277 }
 0x2d8   :  { %v2280_v41 = vpop.eup %2279  ;;  %v1492_v56 = vadd.f32 1.0, %v2278_v52 }
 0x2d9   :  { %v2282_v42 = vpop.eup %2281  ;;  %v1493_v1 = vadd.f32 1.0, %v2280_v41  ;;  %v3580_v41 = vld [vmem:[#allocation3 + $0x8] sm:$0xff] }
 0x2da   :  { %v2284_v25 = vpop.eup %2283  ;;  %2285 = vrcp.f32 %v1492_v56  ;;  %v1494_v31 = vadd.f32 1.0, %v2282_v42 }
 0x2db   :  { %2287 = vrcp.f32 %v1493_v1  ;;  %v1495_v43 = vadd.f32 1.0, %v2284_v25  ;;  %v3585_v1 = vld [vmem:[#allocation3 + $0x10] sm:$0xff] }
 0x2dc   :  { %2289 = vrcp.f32 %v1494_v31  ;;  %v3588_v31 = vld [vmem:[#allocation3] sm:$0xff] }
 0x2dd   :  { %2291 = vrcp.f32 %v1495_v43 }
 0x2e4   :  { %v2286_v19 = vpop.eup %2285 }
 0x2e5   :  { %v2288_v17 = vpop.eup %2287  ;;  %v3379_v58 = vmul.f32 %v2286_v19, %v1405_v9  ;;  %v3591_v19 = vld [vmem:[#allocation3 + $0x18] sm:$0xff] }
 0x2e6   :  { %v2290_v35 = vpop.eup %2289  ;;  %v3387_v49 = vmul.f32 %v2288_v17, %v1407_v46  ;;  %v1754_v46 = vld [vmem:[%s4038_s2 + $0xd0] sm:$0xff] }
 0x2e7   :  { %1697 = vrot.lane.b32.xlu0 %v3379_v58, %s2409_s15  ;;  %1505 = vrot.lane.b32.xlu1 %v3379_v58, %s2402_s30  ;;  %v3385_v30 = vmul.f32 %v2290_v35, %v1476_v20  ;;  %v2292_v3 = vpop.eup %2291 }
 0x2e8   :  { %v3393_v9 = vmul.f32 %v2292_v3, %v1478_v63  ;;  %v3596_v3 = vld [vmem:[#allocation3 + $0x28] sm:$0xff] }
 0x2eb   :  { %1507 = vrot.lane.b32.xlu0 %v3387_v49, %s2402_s30  ;;  %1509 = vrot.lane.b32.xlu1 %v3385_v30, %s2402_s30 }
 0x2ef   :  { %1511 = vrot.lane.b32.xlu0 %v3393_v9, %s2402_s30  ;;  %1531 = vrot.lane.b32.xlu1 %v3379_v58, %s2403_s7 }
 0x2f3   :  { %1533 = vrot.lane.b32.xlu0 %v3387_v49, %s2403_s7  ;;  %1535 = vrot.lane.b32.xlu1 %v3385_v30, %s2403_s7 }
 0x2f7   :  { %1537 = vrot.lane.b32.xlu0 %v3393_v9, %s2403_s7  ;;  %1557 = vrot.lane.b32.xlu1 %v3379_v58, %s2404_s10 }
 0x2fb   :  { %1559 = vrot.lane.b32.xlu0 %v3387_v49, %s2404_s10  ;;  %1561 = vrot.lane.b32.xlu1 %v3385_v30, %s2404_s10 }
 0x2ff   :  { %1563 = vrot.lane.b32.xlu0 %v3393_v9, %s2404_s10  ;;  %1583 = vrot.lane.b32.xlu1 %v3379_v58, %s2405_s11 }
 0x303   :  { %1585 = vrot.lane.b32.xlu0 %v3387_v49, %s2405_s11  ;;  %1587 = vrot.lane.b32.xlu1 %v3385_v30, %s2405_s11 }
 0x307   :  { %1589 = vrot.lane.b32.xlu0 %v3393_v9, %s2405_s11  ;;  %1619 = vrot.lane.b32.xlu1 %v3379_v58, %s2406_s12 }
 0x30b   :  { %1621 = vrot.lane.b32.xlu0 %v3387_v49, %s2406_s12  ;;  %1623 = vrot.lane.b32.xlu1 %v3385_v30, %s2406_s12 }
 0x30f   :  { %1625 = vrot.lane.b32.xlu0 %v3393_v9, %s2406_s12  ;;  %1645 = vrot.lane.b32.xlu1 %v3379_v58, %s2407_s13 }
 0x313   :  { %1647 = vrot.lane.b32.xlu0 %v3387_v49, %s2407_s13  ;;  %1649 = vrot.lane.b32.xlu1 %v3385_v30, %s2407_s13 }
 0x317   :  { %1651 = vrot.lane.b32.xlu0 %v3393_v9, %s2407_s13  ;;  %1671 = vrot.lane.b32.xlu1 %v3379_v58, %s2408_s14 }
 0x31b   :  { %1673 = vrot.lane.b32.xlu0 %v3387_v49, %s2408_s14  ;;  %1675 = vrot.lane.b32.xlu1 %v3385_v30, %s2408_s14 }
 0x31f   :  { %1677 = vrot.lane.b32.xlu0 %v3393_v9, %s2408_s14  ;;  %1699 = vrot.lane.b32.xlu1 %v3387_v49, %s2409_s15 }
 0x323   :  { %1701 = vrot.lane.b32.xlu0 %v3385_v30, %s2409_s15  ;;  %1703 = vrot.lane.b32.xlu1 %v3393_v9, %s2409_s15 }
 0x327   :  { %1757 = vperm.xlu0 %2241, %v1754_v46   ;;  %836 = vrot.lane.b32.xlu1 %v3307_v14, %s2402_s30  ;;  %v3476_v14 = vpop.permute.xlu1 %1523 }
 0x32b   :  { %838 = vrot.lane.b32.xlu0 %v3309_v10, %s2402_s30  ;;  %840 = vrot.lane.b32.xlu1 %v3313_v55, %s2402_s30  ;;  %v3482_v10 = vpop.permute.xlu0 %1549 }
 0x32f   :  { %842 = vrot.lane.b32.xlu0 %v3317_v34, %s2402_s30  ;;  %852 = vrot.lane.b32.xlu1 %v3311_v13, %s2403_s7  ;;  %v3484_v13 = vpop.permute.xlu1 %1575  ;;  %v3494_v55 = vpop.permute.xlu0 %1601 }
 0x333   :  { %854 = vrot.lane.b32.xlu0 %v3315_v2, %s2403_s7  ;;  %856 = vrot.lane.b32.xlu1 %v3321_v6, %s2403_s7  ;;  %v3496_v2 = vpop.permute.xlu1 %1611  ;;  %v3502_v34 = vpop.permute.xlu0 %1637 }
 0x337   :  { %858 = vrot.lane.b32.xlu0 %v3325_v24, %s2403_s7  ;;  %868 = vrot.lane.b32.xlu1 %v3319_v36, %s2404_s10  ;;  %v3504_v36 = vpop.permute.xlu1 %1663  ;;  %v3514_v6 = vpop.permute.xlu0 %1689 }
 0x33b   :  { %870 = vrot.lane.b32.xlu0 %v3323_v0, %s2404_s10  ;;  %872 = vrot.lane.b32.xlu1 %v3329_v12, %s2404_s10  ;;  %v3516_v0 = vpop.permute.xlu1 %1715  ;;  %v996_v12 = vld [vmem:[%s4038_s2 + $0xb8] sm:$0xff] }
 0x33f   :  { %874 = vrot.lane.b32.xlu0 %v3333_v15, %s2404_s10  ;;  %884 = vrot.lane.b32.xlu1 %v3327_v57, %s2405_s11 }
 0x343   :  { %886 = vrot.lane.b32.xlu0 %v3331_v27, %s2405_s11  ;;  %888 = vrot.lane.b32.xlu1 %v3337_v45, %s2405_s11  ;;  %v1789_v45 = vld [vmem:[%s4038_s2 + $0xd8] sm:$0xff] }
 0x347   :  { %890 = vrot.lane.b32.xlu0 %v3341_v5, %s2405_s11  ;;  %900 = vrot.lane.b32.xlu1 %v3343_v8, %s2406_s12 }
 0x34b   :  { %902 = vrot.lane.b32.xlu0 %v3347_v11, %s2406_s12  ;;  %904 = vrot.lane.b32.xlu1 %v3353_v39, %s2406_s12 }
 0x34f   :  { %906 = vrot.lane.b32.xlu0 %v3357_v44, %s2406_s12  ;;  %916 = vrot.lane.b32.xlu1 %v3351_v60, %s2407_s13  ;;  %v1982_v44 = vld [vmem:[%s4038_s2 + $0xe0] sm:$0xff] }
 0x353   :  { %918 = vrot.lane.b32.xlu0 %v3355_v22, %s2407_s13  ;;  %920 = vrot.lane.b32.xlu1 %v3361_v53, %s2407_s13 }
 0x357   :  { %922 = vrot.lane.b32.xlu0 %v3365_v37, %s2407_s13  ;;  %932 = vrot.lane.b32.xlu1 %v3359_v54, %s2408_s14  ;;  %v1983_v54 = vld [vmem:[%s4038_s2 + $0xe8] sm:$0xff] }
 0x359   :  { %v3522_v24 = vpop.permute.xlu0 %1697  ;;  %v1506_v57 = vpop.permute.xlu1 %1505 }
 0x35b   :  { %934 = vrot.lane.b32.xlu0 %v3363_v48, %s2408_s14  ;;  %936 = vrot.lane.b32.xlu1 %v3369_v61, %s2408_s14 }
 0x35d   :  { %v1508_v27 = vpop.permute.xlu0 %1507  ;;  %v1510_v15 = vpop.permute.xlu1 %1509 }
 0x35e   :  { %v1515_v50 = vsel %vm328_vm2, %v1506_v57, %v1508_v27  ;;  %v1514_v63 = vsel %vm328_vm2, %v1508_v27, %v1510_v15  ;;  %v3602_v27 = vld [vmem:[#allocation3 + $0x20] sm:$0xff] }
 0x35f   :  { %938 = vrot.lane.b32.xlu0 %v3373_v47, %s2408_s14  ;;  %999 = vperm.xlu1 %2242, %v996_v12   ;;  %v1518_v56 = vmul.f32 %v3580_v41, %v1515_v50  ;;  %v1519_v25 = vmul.f32 %v3585_v1, %v1514_v63  ;;  %v3628_v63 = vld [vmem:[#allocation3 + $0x48] sm:$0xff] }
 0x361   :  { %v1512_v5 = vpop.permute.xlu0 %1511  ;;  %v1532_v8 = vpop.permute.xlu1 %1531  ;;  %v3626_v50 = vmul.f32 %v3476_v14, %v1518_v56 }
 0x362   :  { %v1513_v7 = vsel %vm328_vm2, %v1510_v15, %v1512_v5  ;;  %v1516_v26 = vsel %vm328_vm2, %v1512_v5, %v1506_v57  ;;  %v3599_v57 = vld [vmem:[#allocation3 + $0x30] sm:$0xff] }
 0x363   :  { %1792 = vperm.xlu0 %2241, %v1789_v45   ;;  %948 = vrot.lane.b32.xlu1 %v3367_v18, %s2409_s15  ;;  %v1517_v43 = vmul.f32 %v3588_v31, %v1516_v26  ;;  %v1520_v17 = vmul.f32 %v3591_v19, %v1513_v7 }
 0x365   :  { %v1534_v11 = vpop.permute.xlu0 %1533  ;;  %v1536_v60 = vpop.permute.xlu1 %1535  ;;  %v3650_v56 = vmul.f32 %v3476_v14, %v1520_v17 }
 0x366   :  { %v1541_v23 = vsel %vm349_vm3, %v1532_v8, %v1534_v11  ;;  %v1540_v4 = vsel %vm349_vm3, %v1534_v11, %v1536_v60  ;;  %v3612_v11 = vld [vmem:[#allocation3 + $0x38] sm:$0xff] }
 0x367   :  { %950 = vrot.lane.b32.xlu0 %v3371_v33, %s2409_s15  ;;  %952 = vrot.lane.b32.xlu1 %v3375_v16, %s2409_s15  ;;  %v1544_v46 = vmul.f32 %v3596_v3, %v1541_v23  ;;  %v1545_v12 = vmul.f32 %v3599_v57, %v1540_v4  ;;  %v3646_v4 = vld [vmem:[#allocation3 + $0xa0] sm:$0xff] }
 0x368   :  { %4174 = vst [vmem:[#allocation25_spill] sm:$0xff] %v3646_v4 }
 0x369   :  { %v1538_v39 = vpop.permute.xlu0 %1537  ;;  %v1558_v22 = vpop.permute.xlu1 %1557 }
 0x36a   :  { %v1542_v52 = vsel %vm349_vm3, %v1538_v39, %v1532_v8  ;;  %v1539_v42 = vsel %vm349_vm3, %v1536_v60, %v1538_v39  ;;  %v1614_v39 = vmul.f32 %v3496_v2, %v3379_v58  ;;  %v3636_v58 = vmul.f32 %v3496_v2, %v3393_v9 }
 0x36b   :  { %954 = vrot.lane.b32.xlu0 %v3377_v59, %s2409_s15  ;;  %1986 = vperm.xlu1 %2242, %v1982_v44   ;;  %v1543_v15 = vmul.f32 %v3602_v27, %v1542_v52  ;;  %v1546_v60 = vmul.f32 %v3612_v11, %v1539_v42  ;;  %v3619_v44 = vmul.f32 %v3496_v2, %v3387_v49 }
 0x36c   :  { %v3639_v49 = vmul.f32 %v3476_v14, %v1519_v25  ;;  %v3656_v9 = vmul.f32 %v3482_v10, %v1545_v12  ;;  %v3679_v12 = vld [vmem:[#allocation3 + $0x40] sm:$0xff] }
 0x36d   :  { %v1560_v53 = vpop.permute.xlu0 %1559  ;;  %v3550_v48 = vpop.permute.xlu1 %1561  ;;  %4175 = vst [vmem:[#allocation28_spill] sm:$0xff] %v3679_v12 }
 0x36e   :  { %v1567_v35 = vsel %vm371_vm4, %v1558_v22, %v1560_v53  ;;  %v1566_v26 = vsel %vm371_vm4, %v1560_v53, %v3550_v48  ;;  %v3653_v53 = vmul.f32 %v3482_v10, %v1544_v46 }
 0x36f   :  { %1991 = vperm.xlu0 %2241, %v1983_v54   ;;  %v3623_v54 = vmul.f32 %v3496_v2, %v3385_v30  ;;  %v1570_v7 = vmul.f32 %v3628_v63, %v1567_v35  ;;  %v3642_v30 = vmul.f32 %v3476_v14, %v1517_v43  ;;  %v3659_v2 = vmul.f32 %v3482_v10, %v1543_v15  ;;  %v3664_v43 = vld [vmem:[#allocation3 + $0x50] sm:$0xff] }
 0x370   :  { %v3667_v35 = vmul.f32 %v3664_v43, %v1566_v26  ;;  %v3702_v26 = vld [vmem:[#allocation3 + $0x58] sm:$0xff] }
 0x371   :  { %v1564_v37 = vpop.permute.xlu0 %1563  ;;  %v3552_v18 = vpop.permute.xlu1 %1583  ;;  %v3677_v46 = vmul.f32 %v3484_v13, %v1570_v7  ;;  %4176 = vst [vmem:[#allocation6_spill] sm:$0xff] %v3702_v26 }
 0x372   :  { %v1568_v23 = vsel %vm371_vm4, %v1564_v37, %v1558_v22  ;;  %v3662_v22 = vmul.f32 %v3482_v10, %v1546_v60  ;;  %v1565_v14 = vsel %vm371_vm4, %v3550_v48, %v1564_v37 }
 0x373   :  { %v3682_v10 = vmul.f32 %v3679_v12, %v1568_v23  ;;  %v3711_v23 = vld [vmem:[#allocation3 + $0xc0] sm:$0xff]  ;;  %v3744_v12 = vld [vmem:[#allocation3 + $0xd0] sm:$0xff] }
 0x374   :  { %4177 = vst [vmem:[#allocation8_spill] sm:$0xff] %v3711_v23  ;;  %4183 = vst [vmem:[#allocation20_spill] sm:$0xff] %v3744_v12 }
 0x375   :  { %v3554_v61 = vpop.permute.xlu0 %1585  ;;  %v3556_v33 = vpop.permute.xlu1 %1587 }
 0x376   :  { %v1592_v37 = vsel %vm393_vm5, %v3554_v61, %v3556_v33 }
 0x379   :  { %v3558_v47 = vpop.permute.xlu0 %1589  ;;  %v1620_v16 = vpop.permute.xlu1 %1619 }
 0x37a   :  { %v1594_v60 = vsel %vm393_vm5, %v3558_v47, %v3552_v18 }
 0x37d   :  { %v3560_v59 = vpop.permute.xlu0 %1621  ;;  %v3562_v20 = vpop.permute.xlu1 %1623 }
 0x37e   :  { %v1629_v45 = vsel %vm415_vm6, %v1620_v16, %v3560_v59 }
 0x37f   :  { %v1631_v52 = vmul.f32 %v3646_v4, %v1629_v45  ;;  %v1591_v45 = vsel %vm393_vm5, %v3556_v33, %v3558_v47 }
 0x381   :  { %v1626_v38 = vpop.permute.xlu0 %1625  ;;  %v3572_v29 = vpop.permute.xlu1 %1645  ;;  %v1640_v7 = vmul.f32 %v3502_v34, %v1631_v52 }
 0x382   :  { %v1627_v15 = vsel %vm415_vm6, %v3562_v20, %v1626_v38  ;;  %v1630_v48 = vsel %vm415_vm6, %v1626_v38, %v1620_v16  ;;  %v3705_v16 = vmul.f32 %v3702_v26, %v1565_v14  ;;  %v1593_v38 = vsel %vm393_vm5, %v3552_v18, %v3554_v61  ;;  %v3720_v26 = vld [vmem:[#allocation3 + $0xb8] sm:$0xff] }
 0x383   :  { %v1633_v14 = vmul.f32 %v3717_v40, %v1627_v15  ;;  %4179 = vst [vmem:[#allocation30_spill] sm:$0xff] %v3720_v26  ;;  %v1634_v62 = vmul.f32 %v3720_v26, %v1630_v48  ;;  %v3734_v15 = vld [vmem:[#allocation3 + $0x78] sm:$0xff]  ;;  %v3737_v48 = vld [vmem:[#allocation3 + $0xe0] sm:$0xff] }
 0x384   :  { %4181 = vst [vmem:[#allocation18_spill] sm:$0xff] %v3734_v15  ;;  %v1598_v40 = vmul.f32 %v3734_v15, %v1591_v45  ;;  %4182 = vst [vmem:[#allocation17_spill] sm:$0xff] %v3737_v48 }
 0x385   :  { %v3608_v5 = vpop.permute.xlu0 %1647  ;;  %v3610_v8 = vpop.permute.xlu1 %1649 }
 0x386   :  { %v1655_v17 = vsel %vm437_vm7, %v3572_v29, %v3608_v5  ;;  %v1654_v45 = vsel %vm437_vm7, %v3608_v5, %v3610_v8 }
 0x387   :  { %v1657_v33 = vmul.f32 %v3711_v23, %v1655_v17  ;;  %v3728_v17 = vld [vmem:[#allocation3 + $0x70] sm:$0xff]  ;;  %v3731_v23 = vld [vmem:[#allocation3 + $0x60] sm:$0xff] }
 0x388   :  { %v1597_v32 = vmul.f32 %v3728_v17, %v1592_v37  ;;  %4180 = vst [vmem:[#allocation9_spill] sm:$0xff] %v3731_v23  ;;  %v1595_v4 = vmul.f32 %v3731_v23, %v1594_v60 }
 0x389   :  { %v1652_v42 = vpop.permute.xlu0 %1651  ;;  %v1672_v25 = vpop.permute.xlu1 %1671  ;;  %v1666_v23 = vmul.f32 %v3504_v36, %v1657_v33 }
 0x38a   :  { %v1653_v47 = vsel %vm437_vm7, %v3610_v8, %v1652_v42  ;;  %v1656_v18 = vsel %vm437_vm7, %v1652_v42, %v3572_v29  ;;  %v1730_v29 = vadd.f32 %v1640_v7, %v1614_v39  ;;  %v1628_v42 = vsel %vm415_vm6, %v3560_v59, %v3562_v20  ;;  %v3754_v39 = vld [vmem:[#allocation3 + $0xd8] sm:$0xff]  ;;  %v3767_v8 = vld [vmem:[#allocation3 + $0xf0] sm:$0xff] }
 0x38b   :  { %v1659_v37 = vmul.f32 %v3744_v12, %v1653_v47  ;;  %4184 = vst [vmem:[#allocation19_spill] sm:$0xff] %v3754_v39  ;;  %v1660_v7 = vmul.f32 %v3754_v39, %v1656_v18  ;;  %v1643_v47 = vmul.f32 %v3502_v34, %v1634_v62  ;;  %v3764_v12 = vld [vmem:[#allocation3 + $0xe8] sm:$0xff]  ;;  %4186 = vst [vmem:[#allocation21_spill] sm:$0xff] %v3767_v8  ;;  %v3770_v18 = vld [vmem:[#allocation3 + $0xf8] sm:$0xff] }
 0x38c   :  { %4185 = vst [vmem:[#allocation22_spill] sm:$0xff] %v3764_v12  ;;  %4187 = vst [vmem:[#allocation24_spill] sm:$0xff] %v3770_v18  ;;  %v3773_v39 = vld [vmem:[#allocation3 + $0x68] sm:$0xff] }
 0x38d   :  { %v1674_v51 = vpop.permute.xlu0 %1673  ;;  %v1676_v52 = vpop.permute.xlu1 %1675 }
 0x38e   :  { %v1681_v61 = vsel %vm459_vm8, %v1672_v25, %v1674_v51  ;;  %v1680_v60 = vsel %vm459_vm8, %v1674_v51, %v1676_v52 }
 0x38f   :  { %v1683_v26 = vmul.f32 %v3737_v48, %v1681_v61  ;;  %v1642_v61 = vmul.f32 %v3502_v34, %v1633_v14  ;;  %v1684_v5 = vmul.f32 %v3764_v12, %v1680_v60  ;;  %v3776_v48 = vld [vmem:[#allocation3 + $0xa8] sm:$0xff]  ;;  %v1607_v12 = vmul.f32 %v3494_v55, %v1598_v40 }
 0x390   :  { %4188 = vst [vmem:[#allocation31_spill] sm:$0xff] %v3776_v48 }
 0x391   :  { %v1692_v59 = vmul.f32 %v3514_v6, %v1683_v26  ;;  %v1678_v20 = vpop.permute.xlu0 %1677  ;;  %v1700_v62 = vpop.permute.xlu1 %1699 }
 0x392   :  { %v1679_v51 = vsel %vm459_vm8, %v1676_v52, %v1678_v20  ;;  %v1682_v33 = vsel %vm459_vm8, %v1678_v20, %v1672_v25  ;;  %v1596_v52 = vmul.f32 %v3773_v39, %v1593_v38  ;;  %v1632_v25 = vmul.f32 %v3776_v48, %v1628_v42 }
 0x393   :  { %v1734_v15 = vadd.f32 %v1692_v59, %v1666_v23  ;;  %v1685_v26 = vmul.f32 %v3767_v8, %v1679_v51  ;;  %v1686_v14 = vmul.f32 %v3770_v18, %v1682_v33  ;;  %v3779_v23 = vld [vmem:[#allocation3 + $0xc8] sm:$0xff]  ;;  %v1668_v59 = vmul.f32 %v3504_v36, %v1659_v37 }
 0x394   :  { %4189 = vst [vmem:[#allocation32_spill] sm:$0xff] %v3779_v23  ;;  %v1658_v60 = vmul.f32 %v3779_v23, %v1654_v45  ;;  %v1669_v20 = vmul.f32 %v3504_v36, %v1660_v7  ;;  %v1606_v8 = vmul.f32 %v3494_v55, %v1597_v32  ;;  %v1604_v38 = vmul.f32 %v3494_v55, %v1595_v4 }
 0x395   :  { %v1742_v51 = vadd.f32 %v1734_v15, %v1730_v29  ;;  %v1694_v33 = vmul.f32 %v3514_v6, %v1685_v26  ;;  %v1695_v18 = vmul.f32 %v3514_v6, %v1686_v14  ;;  %v1732_v42 = vadd.f32 %v1642_v61, %v3623_v54  ;;  %v1702_v7 = vpop.permute.xlu0 %1701  ;;  %v1704_v61 = vpop.permute.xlu1 %1703 }
 0x396   :  { %v1733_v48 = vadd.f32 %v1643_v47, %v3636_v58  ;;  %v1693_v45 = vmul.f32 %v3514_v6, %v1684_v5  ;;  %v1580_v15 = vmul.f32 %v3484_v13, %v3667_v35  ;;  %v1578_v29 = vmul.f32 %v3484_v13, %v3682_v10 }
 0x397   :  { %v1736_v37 = vadd.f32 %v1694_v33, %v1668_v59  ;;  %v1737_v23 = vadd.f32 %v1695_v18, %v1669_v20  ;;  %v1581_v32 = vmul.f32 %v3484_v13, %v3705_v16  ;;  %v1605_v40 = vmul.f32 %v3494_v55, %v1596_v52  ;;  %v3824_v18 = vld [vmem:[#allocation3 + $0x100] sm:$0xff] }
 0x398   :  { %v1641_v54 = vmul.f32 %v3502_v34, %v1632_v25  ;;  %v1667_v58 = vmul.f32 %v3504_v36, %v1658_v60  ;;  %v1728_v47 = vadd.f32 %v1606_v8, %v1580_v15  ;;  %v1726_v5 = vadd.f32 %v1604_v38, %v1578_v29 }
 0x399   :  { %v1744_v4 = vadd.f32 %v1736_v37, %v1732_v42  ;;  %v1745_v6 = vadd.f32 %v1737_v23, %v1733_v48  ;;  %v1729_v26 = vadd.f32 %v1607_v12, %v1581_v32  ;;  %v1706_v35 = vsel %vm481_vm9, %v1700_v62, %v1702_v7 }
 0x39a   :  { %v1724_v10 = vadd.f32 %v3656_v9, %v3639_v49  ;;  %v1722_v13 = vadd.f32 %v3659_v2, %v3642_v30  ;;  %v1725_v55 = vadd.f32 %v3662_v22, %v3650_v56  ;;  %v1735_v34 = vadd.f32 %v1693_v45, %v1667_v58  ;;  %v3819_v30 = vld [vmem:[#allocation3 + $0x108] sm:$0xff] }
 0x39b   :  { %v1727_v36 = vadd.f32 %v1605_v40, %v3677_v46  ;;  %v1707_v16 = vsel %vm481_vm9, %v3522_v24, %v1700_v62  ;;  %v1705_v12 = vsel %vm481_vm9, %v1702_v7, %v1704_v61  ;;  %v1708_v49 = vsel %vm481_vm9, %v1704_v61, %v3522_v24  ;;  %v3827_v62 = vld [vmem:[#allocation3 + $0x110] sm:$0xff] }
 0x39c   :  { %v1731_v9 = vadd.f32 %v1641_v54, %v3619_v44  ;;  %v1710_v56 = vmul.f32 %v3819_v30, %v1706_v35  ;;  %v1723_v2 = vadd.f32 %v3653_v53, %v3626_v50  ;;  %v1740_v22 = vadd.f32 %v1728_v47, %v1724_v10  ;;  %v3830_v44 = vld [vmem:[#allocation3 + $0x118] sm:$0xff] }
 0x39d   :  { %v1738_v46 = vadd.f32 %v1726_v5, %v1722_v13  ;;  %v1741_v48 = vadd.f32 %v1729_v26, %v1725_v55  ;;  %v1709_v14 = vmul.f32 %v3824_v18, %v1707_v16  ;;  %v1711_v24 = vmul.f32 %v3827_v62, %v1705_v12 }
 0x39e   :  { %v1743_v8 = vadd.f32 %v1735_v34, %v1731_v9  ;;  %v1712_v52 = vmul.f32 %v3830_v44, %v1708_v49  ;;  %v1739_v25 = vadd.f32 %v1727_v36, %v1723_v2  ;;  %v1719_v50 = vmul.f32 %v3516_v0, %v1710_v56 }
 0x39f   :  { %v1746_v23 = vadd.f32 %v1742_v51, %v1738_v46  ;;  %v1748_v53 = vadd.f32 %v1744_v4, %v1740_v22  ;;  %v1749_v60 = vadd.f32 %v1745_v6, %v1741_v48  ;;  %v1718_v59 = vmul.f32 %v3516_v0, %v1709_v14  ;;  %v1788_v46 = vld [vmem:[%s4038_s2 + $0x98] sm:$0xff] }
 0x3a0   :  { %v1747_v20 = vadd.f32 %v1743_v8, %v1739_v25  ;;  %v1720_v33 = vmul.f32 %v3516_v0, %v1711_v24  ;;  %v1721_v38 = vmul.f32 %v3516_v0, %v1712_v52  ;;  %v837_v24 = vpop.permute.xlu1 %836 }
 0x3a1   :  { %v1750_v42 = vadd.f32 %v1746_v23, %v1718_v59 }
 0x3a2   :  { %v1751_v45 = vadd.f32 %v1747_v20, %v1719_v50  ;;  %v1752_v37 = vadd.f32 %v1748_v53, %v1720_v33  ;;  %v1753_v7 = vadd.f32 %v1749_v60, %v1721_v38 }
 0x3a4   :  { %v841_v25 = vpop.permute.xlu1 %840 }
 0x3a6   :  { %v1758_v15 = vpop.permute.xlu0 %1757 }
 0x3a7   :  { %v1760_v29 = vadd.f32 %v1758_v15, %v1750_v42  ;;  %v1761_v32 = vadd.f32 %v1758_v15, %v1751_v45  ;;  %v1762_v40 = vadd.f32 %v1758_v15, %v1752_v37  ;;  %v1763_v51 = vadd.f32 %v1758_v15, %v1753_v7 }
 0x3a8   :  { %v853_v50 = vpop.permute.xlu1 %852 }
 0x3a9   :  { %v1764_v54 = vsub.f32 0.0, %v1760_v29  ;;  %v1765_v58 = vsub.f32 0.0, %v1761_v32  ;;  %v1766_v4 = vsub.f32 0.0, %v1762_v40  ;;  %v1767_v6 = vsub.f32 0.0, %v1763_v51 }
 0x3aa   :  { %v839_v14 = vpop.permute.xlu0 %838 }
 0x3ab   :  { %v1768_v61 = vmul.f32 1.442695, %v1764_v54  ;;  %v1770_v47 = vmul.f32 1.442695, %v1765_v58  ;;  %v1772_v5 = vmul.f32 1.442695, %v1766_v4 }
 0x3ac   :  { %v1774_v26 = vmul.f32 1.442695, %v1767_v6  ;;  %v857_v60 = vpop.permute.xlu1 %856 }
 0x3ad   :  { %2293 = vpow2.f32 %v1768_v61 }
 0x3ae   :  { %2295 = vpow2.f32 %v1770_v47  ;;  %v843_v52 = vpop.permute.xlu0 %842 }
 0x3af   :  { %2297 = vpow2.f32 %v1772_v5 }
 0x3b0   :  { %2299 = vpow2.f32 %v1774_v26  ;;  %v869_v20 = vpop.permute.xlu1 %868 }
 0x3b2   :  { %v855_v23 = vpop.permute.xlu0 %854 }
 0x3b3   :  { %v862_v5 = vsel %vm349_vm3, %v853_v50, %v855_v23 }
 0x3b4   :  { %v3846_v38 = vpop.permute.xlu1 %872 }
 0x3b6   :  { %v859_v53 = vpop.permute.xlu0 %858 }
 0x3b7   :  { %v2294_v0 = vpop.eup %2293 }
 0x3b8   :  { %v2296_v35 = vpop.eup %2295  ;;  %v1776_v10 = vadd.f32 1.0, %v2294_v0  ;;  %v885_v45 = vpop.permute.xlu1 %884  ;;  %v863_v0 = vsel %vm349_vm3, %v859_v53, %v853_v50 }
 0x3b9   :  { %v2298_v13 = vpop.eup %2297  ;;  %v1777_v55 = vadd.f32 1.0, %v2296_v35  ;;  %v845_v35 = vsel %vm328_vm2, %v839_v14, %v841_v25 }
 0x3ba   :  { %v2300_v34 = vpop.eup %2299  ;;  %v1778_v36 = vadd.f32 1.0, %v2298_v13  ;;  %2301 = vrcp.f32 %v1776_v10  ;;  %v871_v59 = vpop.permute.xlu0 %870  ;;  %v846_v10 = vsel %vm328_vm2, %v837_v24, %v839_v14  ;;  %v844_v13 = vsel %vm328_vm2, %v841_v25, %v843_v52  ;;  %v4190_v25 = vld [vmem:[#allocation28_spill] sm:$0xff] }
 0x3bb   :  { %v1779_v16 = vadd.f32 1.0, %v2300_v34  ;;  %2303 = vrcp.f32 %v1777_v55  ;;  %v847_v55 = vsel %vm328_vm2, %v843_v52, %v837_v24  ;;  %v865_v34 = vmul.f32 %v3596_v3, %v862_v5 }
 0x3bc   :  { %2305 = vrcp.f32 %v1778_v36  ;;  %v3850_v7 = vpop.permute.xlu1 %888  ;;  %v861_v36 = vsel %vm349_vm3, %v855_v23, %v857_v60  ;;  %v848_v3 = vmul.f32 %v3588_v31, %v847_v55 }
 0x3bd   :  { %2307 = vrcp.f32 %v1779_v16  ;;  %v860_v16 = vsel %vm349_vm3, %v857_v60, %v859_v53 }
 0x3be   :  { %v3844_v33 = vpop.permute.xlu0 %874 }
 0x3c2   :  { %v887_v42 = vpop.permute.xlu0 %886 }
 0x3c3   :  { %v894_v31 = vsel %vm393_vm5, %v885_v45, %v887_v42  ;;  %v893_v24 = vsel %vm393_vm5, %v887_v42, %v3850_v7 }
 0x3c4   :  { %v2302_v12 = vpop.eup %2301 }
 0x3c5   :  { %v2304_v49 = vpop.eup %2303  ;;  %v1784_v9 = vmul.f32 %v2302_v12, %v1760_v29  ;;  %v3852_v29 = vpop.permute.xlu1 %900  ;;  %v864_v12 = vmul.f32 %v3602_v27, %v863_v0  ;;  %v877_v27 = vsel %vm371_vm4, %v871_v59, %v3846_v38  ;;  %v4192_v0 = vld [vmem:[#allocation9_spill] sm:$0xff] }
 0x3c6   :  { %v2306_v56 = vpop.eup %2305  ;;  %v1785_v2 = vmul.f32 %v2304_v49, %v1761_v32  ;;  %v3848_v37 = vpop.permute.xlu0 %890 }
 0x3c7   :  { %v2308_v22 = vpop.eup %2307  ;;  %v1786_v48 = vmul.f32 %v2306_v56, %v1762_v40  ;;  %v3876_v56 = vmul.f32 %v3585_v1, %v845_v35  ;;  %v866_v1 = vmul.f32 %v3599_v57, %v861_v36  ;;  %v882_v57 = vmul.f32 %v3664_v43, %v877_v27  ;;  %v4195_v36 = vld [vmem:[#allocation8_spill] sm:$0xff] }
 0x3c8   :  { %1798 = vmatprep.subr.mxu0 %v1785_v2  ;;  %v1787_v8 = vmul.f32 %v2308_v22, %v1763_v51  ;;  %v878_v2 = vsel %vm371_vm4, %v869_v20, %v871_v59 }
 0x3c9   :  { %1799 = vmatpush1.msra.mxu0 %v1784_v9  ;;  %v905_v40 = vpop.permute.xlu1 %904  ;;  %v849_v9 = vmul.f32 %v3580_v41, %v846_v10  ;;  %v879_v41 = vsel %vm371_vm4, %v3844_v33, %v869_v20  ;;  %v881_v14 = vmul.f32 %v3628_v63, %v878_v2  ;;  %v897_v63 = vmul.f32 %v3773_v39, %v894_v31  ;;  %v4191_v39 = vld [vmem:[#allocation17_spill] sm:$0xff] }
 0x3ca   :  { %2214 = vmatmul.mubr.msk.f32.vlgmr.msra.gmra.mrb[38].mxu0 %vm570_vm10, %v1788_v46  ;;  %1869 = vmatprep.subr.mxu1 %v1787_v8  ;;  %v903_v15 = vpop.permute.xlu0 %902  ;;  %v3896_v8 = vmul.f32 %v3612_v11, %v860_v16  ;;  %v880_v23 = vmul.f32 %v4190_v25, %v879_v41  ;;  %v895_v11 = vsel %vm393_vm5, %v3848_v37, %v885_v45  ;;  %v4196_v16 = vld [vmem:[#allocation21_spill] sm:$0xff]  ;;  %v4199_v41 = vld [vmem:[#allocation10_spill] sm:$0xff] }
 0x3cb   :  { %2065 = vmatprep.mubr.f32.mxu0 %v4167_v28  ;;  %1870 = vmatpush1.msra.mxu1 %v1786_v48  ;;  %v3893_v48 = vadd.f32 %v865_v34, %v849_v9  ;;  %v910_v53 = vsel %vm415_vm6, %v3852_v29, %v903_v15  ;;  %v898_v20 = vmul.f32 %v3728_v17, %v893_v24  ;;  %v4194_v17 = vld [vmem:[#allocation25_spill] sm:$0xff] }
 0x3cc   :  { %2215 = vmatmul.mubr.msk.f32.vlgmr.msra.gmra.mrb[38].mxu1 %vm570_vm10, %v1788_v46  ;;  %v3884_v46 = vmul.f32 %v3591_v19, %v844_v13  ;;  %v964_v19 = vadd.f32 %v864_v12, %v848_v3  ;;  %v909_v42 = vsel %vm415_vm6, %v903_v15, %v905_v40  ;;  %v896_v35 = vmul.f32 %v4192_v0, %v895_v11  ;;  %v4193_v13 = vld [vmem:[#allocation22_spill] sm:$0xff]  ;;  %v4198_v3 = vld [vmem:[#allocation32_spill] sm:$0xff] }
 0x3cd   :  { %2142 = vmatprep.mubr.f32.mxu1 %v4167_v28  ;;  %v917_v54 = vpop.permute.xlu1 %916  ;;  %v912_v34 = vmul.f32 %v4194_v17, %v910_v53  ;;  %v892_v9 = vsel %vm393_vm5, %v3850_v7, %v3848_v37  ;;  %v876_v37 = vsel %vm371_vm4, %v3846_v38, %v3844_v33  ;;  %v969_v7 = vadd.f32 %v897_v63, %v881_v14  ;;  %v4201_v11 = vld [vmem:[#allocation24_spill] sm:$0xff]  ;;  %v4207_v14 = vld [vmem:[#allocation7_spill] sm:$0xff] }
 0x3ce   :  { %v907_v32 = vpop.permute.xlu0 %906  ;;  %v970_v38 = vadd.f32 %v898_v20, %v882_v57 }
 0x3cf   :  { %v908_v10 = vsel %vm415_vm6, %v905_v40, %v907_v32  ;;  %v4197_v40 = vld [vmem:[#allocation31_spill] sm:$0xff]  ;;  %v981_v57 = vadd.f32 %v969_v7, %v3893_v48 }
 0x3d0   :  { %v913_v2 = vmul.f32 %v4197_v40, %v909_v42  ;;  %v914_v31 = vmul.f32 %v4199_v41, %v908_v10  ;;  %v4206_v10 = vld [vmem:[#allocation19_spill] sm:$0xff] }
 0x3d1   :  { %v921_v4 = vpop.permute.xlu1 %920 }
 0x3d2   :  { %v919_v51 = vpop.permute.xlu0 %918  ;;  %v974_v63 = vadd.f32 %v914_v31, %v4207_v14 }
 0x3d3   :  { %v926_v60 = vsel %vm437_vm7, %v917_v54, %v919_v51  ;;  %v925_v45 = vsel %vm437_vm7, %v919_v51, %v921_v4 }
 0x3d4   :  { %v928_v15 = vmul.f32 %v4195_v36, %v926_v60  ;;  %v929_v27 = vmul.f32 %v4198_v3, %v925_v45  ;;  %v968_v60 = vadd.f32 %v896_v35, %v880_v23  ;;  %v4208_v35 = vld [vmem:[#allocation6_spill] sm:$0xff] }
 0x3d5   :  { %v933_v61 = vpop.permute.xlu1 %932 }
 0x3d6   :  { %v923_v58 = vpop.permute.xlu0 %922 }
 0x3d9   :  { %v937_v26 = vpop.permute.xlu1 %936 }
 0x3da   :  { %v935_v6 = vpop.permute.xlu0 %934 }
 0x3db   :  { %v942_v52 = vsel %vm459_vm8, %v933_v61, %v935_v6  ;;  %v941_v50 = vsel %vm459_vm8, %v935_v6, %v937_v26 }
 0x3dc   :  { %v944_v6 = vmul.f32 %v4191_v39, %v942_v52  ;;  %v945_v55 = vmul.f32 %v4193_v13, %v941_v50 }
 0x3de   :  { %v939_v47 = vpop.permute.xlu0 %938  ;;  %v3872_v49 = vpop.permute.xlu1 %999  ;;  %v976_v52 = vadd.f32 %v944_v6, %v928_v15  ;;  %v977_v25 = vadd.f32 %v945_v55, %v929_v27  ;;  %v4205_v6 = vld [vmem:[#allocation30_spill] sm:$0xff]  ;;  %v883_v55 = vmul.f32 %v4208_v35, %v876_v37  ;;  %v966_v15 = vadd.f32 %v866_v1, %v3876_v56 }
 0x3df   :  { %v940_v43 = vsel %vm459_vm8, %v937_v26, %v939_v47  ;;  %v924_v26 = vsel %vm437_vm7, %v921_v4, %v923_v58  ;;  %v943_v51 = vsel %vm459_vm8, %v939_v47, %v933_v61  ;;  %v911_v4 = vsel %vm415_vm6, %v907_v32, %v3852_v29  ;;  %v4200_v47 = vld [vmem:[#allocation20_spill] sm:$0xff]  ;;  %v4202_v32 = vld [vmem:[#allocation18_spill] sm:$0xff] }
 0x3e0   :  { %v946_v12 = vmul.f32 %v4196_v16, %v940_v43  ;;  %v927_v61 = vsel %vm437_vm7, %v923_v58, %v917_v54  ;;  %v930_v24 = vmul.f32 %v4200_v47, %v924_v26  ;;  %v947_v50 = vmul.f32 %v4201_v11, %v943_v51  ;;  %v4203_v43 = vld [vmem:[#allocation14_spill] sm:$0xff]  ;;  %v4204_v58 = vld [vmem:[#allocation29_spill] sm:$0xff] }
 0x3e1   :  { %v899_v53 = vmul.f32 %v4202_v32, %v892_v9  ;;  %v972_v42 = vadd.f32 %v912_v34, %v4203_v43  ;;  %v973_v39 = vadd.f32 %v913_v2, %v4204_v58  ;;  %v915_v0 = vmul.f32 %v4205_v6, %v911_v4  ;;  %v4209_v9 = vld [vmem:[#allocation26_spill] sm:$0xff] }
 0x3e2   :  { %v3880_v22 = vpop.permute.xlu0 %1792  ;;  %v949_v59 = vpop.permute.xlu1 %948  ;;  %v978_v45 = vadd.f32 %v946_v12, %v930_v24  ;;  %v931_v26 = vmul.f32 %v4206_v10, %v927_v61  ;;  %v980_v51 = vadd.f32 %v968_v60, %v964_v19  ;;  %v982_v2 = vadd.f32 %v970_v38, %v966_v15 }
 0x3e3   :  { %v984_v13 = vadd.f32 %v976_v52, %v972_v42  ;;  %v985_v17 = vadd.f32 %v977_v25, %v973_v39  ;;  %v971_v20 = vadd.f32 %v899_v53, %v883_v55  ;;  %v975_v40 = vadd.f32 %v915_v0, %v4209_v9 }
 0x3e4   :  { %v979_v34 = vadd.f32 %v947_v50, %v931_v26  ;;  %v986_v16 = vadd.f32 %v978_v45, %v974_v63  ;;  %v967_v56 = vadd.f32 %v3896_v8, %v3884_v46 }
 0x3e5   :  { %v988_v4 = vadd.f32 %v984_v13, %v980_v51  ;;  %v989_v19 = vadd.f32 %v985_v17, %v981_v57 }
 0x3e6   :  { %v951_v5 = vpop.permute.xlu0 %950  ;;  %v953_v29 = vpop.permute.xlu1 %952  ;;  %v987_v1 = vadd.f32 %v979_v34, %v975_v40  ;;  %v990_v41 = vadd.f32 %v986_v16, %v982_v2  ;;  %v983_v48 = vadd.f32 %v971_v20, %v967_v56 }
 0x3e7   :  { %v958_v33 = vsel %vm481_vm9, %v949_v59, %v951_v5  ;;  %v957_v23 = vsel %vm481_vm9, %v951_v5, %v953_v29 }
 0x3e8   :  { %v960_v12 = vmul.f32 %v3824_v18, %v958_v33  ;;  %v961_v5 = vmul.f32 %v3819_v30, %v957_v23  ;;  %v991_v30 = vadd.f32 %v987_v1, %v983_v48 }
 0x3ea   :  { %v955_v54 = vpop.permute.xlu0 %954  ;;  %v992_v18 = vadd.f32 %v988_v4, %v960_v12  ;;  %v993_v31 = vadd.f32 %v989_v19, %v961_v5 }
 0x3eb   :  { %v956_v36 = vsel %vm481_vm9, %v953_v29, %v955_v54  ;;  %v959_v3 = vsel %vm481_vm9, %v955_v54, %v949_v59 }
 0x3ec   :  { %v962_v27 = vmul.f32 %v3827_v62, %v956_v36  ;;  %v963_v61 = vmul.f32 %v3830_v44, %v959_v3  ;;  %v3981_v24 = vadd.f32 %v3872_v49, %v992_v18  ;;  %v3984_v21 = vadd.f32 %v3872_v49, %v993_v31 }
 0x3ee   :  { %v994_v47 = vadd.f32 %v990_v41, %v962_v27  ;;  %v995_v62 = vadd.f32 %v991_v30, %v963_v61  ;;  %v1006_v46 = vsub.f32 0.0, %v3981_v24  ;;  %v1007_v8 = vsub.f32 0.0, %v3984_v21 }
 0x3f0   :  { %v3987_v59 = vadd.f32 %v3872_v49, %v994_v47  ;;  %v3992_v52 = vadd.f32 %v3872_v49, %v995_v62  ;;  %v1010_v37 = vmul.f32 1.442695, %v1006_v46  ;;  %v1012_v7 = vmul.f32 1.442695, %v1007_v8 }
 0x3f2   :  { %v1008_v44 = vsub.f32 0.0, %v3987_v59  ;;  %v1009_v25 = vsub.f32 0.0, %v3992_v52  ;;  %2309 = vpow2.f32 %v1010_v37 }
 0x3f3   :  { %2311 = vpow2.f32 %v1012_v7  ;;  %v1992_v7 = vpop.permute.xlu0 %1991 }
 0x3f4   :  { %v1014_v11 = vmul.f32 1.442695, %v1008_v44  ;;  %v1016_v29 = vmul.f32 1.442695, %v1009_v25 }
 0x3f6   :  { %2313 = vpow2.f32 %v1014_v11 }
 0x3f7   :  { %2315 = vpow2.f32 %v1016_v29 }
 0x3fc   :  { %v2310_v38 = vpop.eup %2309 }
 0x3fd   :  { %v2312_v14 = vpop.eup %2311  ;;  %v1018_v13 = vadd.f32 1.0, %v2310_v38 }
 0x3fe   :  { %v1019_v23 = vadd.f32 1.0, %v2312_v14 }
 0x400   :  { %v2314_v63 = vpop.eup %2313 }
 0x401   :  { %v2316_v35 = vpop.eup %2315  ;;  %v1020_v55 = vadd.f32 1.0, %v2314_v63 }
 0x49d   :  { %v1864_v50 = vpop.f32.mrb[38].mxu0 }
 0x49e   :  { %v1865_v32 = vadd.f32 %v1864_v50, %v3880_v22  ;;  %v1866_v53 = vpop.f32.mrb[39].mxu0 }
 0x49f   :  { %v1867_v60 = vadd.f32 %v1866_v53, %v3880_v22  ;;  %v1935_v49 = vpop.f32.mrb[38].mxu1 }
 0x4a0   :  { %v1940_v43 = vsub.f32 0.0, %v1865_v32  ;;  %v1936_v42 = vadd.f32 %v1935_v49, %v3880_v22  ;;  %v1937_v54 = vpop.f32.mrb[39].mxu1 }
 0x4a1   :  { %v1941_v45 = vsub.f32 0.0, %v1867_v60  ;;  %v1938_v39 = vadd.f32 %v1937_v54, %v3880_v22  ;;  %v1021_v22 = vadd.f32 1.0, %v2316_v35 }
 0x4a2   :  { %v1944_v58 = vmul.f32 1.442695, %v1940_v43  ;;  %v1942_v6 = vsub.f32 0.0, %v1936_v42 }
 0x4a3   :  { %v1946_v0 = vmul.f32 1.442695, %v1941_v45  ;;  %v1943_v10 = vsub.f32 0.0, %v1938_v39 }
 0x4a4   :  { %2317 = vpow2.f32 %v1944_v58  ;;  %v1948_v26 = vmul.f32 1.442695, %v1942_v6 }
 0x4a5   :  { %2319 = vpow2.f32 %v1946_v0  ;;  %v1950_v33 = vmul.f32 1.442695, %v1943_v10 }
 0x4a6   :  { %2321 = vpow2.f32 %v1948_v26 }
 0x4a7   :  { %2323 = vpow2.f32 %v1950_v33 }
 0x4a8   :  { %2325 = vrcp.f32 %v1018_v13 }
 0x4a9   :  { %2327 = vrcp.f32 %v1019_v23 }
 0x4aa   :  { %2329 = vrcp.f32 %v1020_v55 }
 0x4ae   :  { %v2318_v17 = vpop.eup %2317 }
 0x4af   :  { %v2320_v34 = vpop.eup %2319  ;;  %v1952_v36 = vadd.f32 1.0, %v2318_v17 }
 0x4b0   :  { %v1953_v15 = vadd.f32 1.0, %v2320_v34  ;;  %v2322_v51 = vpop.eup %2321 }
 0x4b1   :  { %2331 = vrcp.f32 %v1952_v36  ;;  %v2324_v16 = vpop.eup %2323  ;;  %v1954_v12 = vadd.f32 1.0, %v2322_v51 }
 0x4b2   :  { %2333 = vrcp.f32 %v1953_v15  ;;  %v1955_v57 = vadd.f32 1.0, %v2324_v16  ;;  %v2326_v20 = vpop.eup %2325 }
 0x4b3   :  { %2335 = vrcp.f32 %v1021_v22  ;;  %v2328_v9 = vpop.eup %2327  ;;  %v1026_v4 = vmul.f32 %v2326_v20, %v3981_v24  ;;  %v1972_v24 = vld [vmem:[%s4038_s2 + $0xa0] sm:$0xff] }
 0x4b4   :  { %2337 = vrcp.f32 %v1954_v12  ;;  %v2330_v40 = vpop.eup %2329  ;;  %v1027_v1 = vmul.f32 %v2328_v9, %v3984_v21  ;;  %v1973_v21 = vld [vmem:[%s4038_s2 + $0xa8] sm:$0xff] }
 0x4b5   :  { %2339 = vrcp.f32 %v1955_v57  ;;  %v1028_v48 = vmul.f32 %v2330_v40, %v3987_v59  ;;  %v1987_v59 = vpop.permute.xlu1 %1986 }
 0x4bb   :  { %v2332_v5 = vpop.eup %2331 }
 0x4bc   :  { %v2334_v2 = vpop.eup %2333  ;;  %v1960_v3 = vmul.f32 %v2332_v5, %v1865_v32 }
 0x4bd   :  { %v2336_v27 = vpop.eup %2335  ;;  %v1961_v56 = vmul.f32 %v2334_v2, %v1867_v60 }
 0x4be   :  { %v2338_v19 = vpop.eup %2337  ;;  %v2222_v18 = vpack.c.bf16 %v1960_v3, %v1026_v4  ;;  %v1029_v30 = vmul.f32 %v2336_v27, %v3992_v52 }
 0x4bf   :  { %v2340_v41 = vpop.eup %2339  ;;  %v1962_v31 = vmul.f32 %v2338_v19, %v1936_v42  ;;  %v2220_v61 = vpack.c.bf16 %v1961_v56, %v1027_v1 }
 0x4c0   :  { %v1963_v47 = vmul.f32 %v2340_v41, %v1938_v39 }
 0x4c1   :  { %v2226_v62 = vpack.c.bf16 %v1962_v31, %v1028_v48  ;;  %2221 = vmatprep.subr.bf16.mxu0 %v2220_v61 }
 0x4c2   :  { %v2224_v46 = vpack.c.bf16 %v1963_v47, %v1029_v30  ;;  %2223 = vmatpush1.bf16.msra.mxu0 %v2222_v18 }
 0x4c4   :  { %2225 = vmatprep.subr.bf16.mxu1 %v2224_v46 }
 0x4c5   :  { %2227 = vmatpush1.bf16.msra.mxu1 %v2226_v62  ;;  %2216 = vmatmul.mubr.msk.f32.vlgmr.msra.gmra.mrb[40].mxu0 %vm1994_vm11, %v1972_v24 }
 0x4c6   :  { %2071 = vmatprep.mubr.f32.mxu0 %v4167_v28 }
 0x4c8   :  { %2218 = vmatmul.mubr.msk.f32.vlgmr.msra.gmra.mrb[40].mxu1 %vm1994_vm11, %v1972_v24 }
 0x4c9   :  { %2148 = vmatprep.mubr.f32.mxu1 %v4167_v28  ;;  %2217 = vmatmul.mubr.msk.f32.gmra.mrb[42].mxu0 %vm1994_vm11, %v1973_v21 }
 0x4cc   :  { %2219 = vmatmul.mubr.msk.f32.gmra.mrb[42].mxu1 %vm1994_vm11, %v1973_v21 }
 0x598   :  { %v2067_v8 = vpop.f32.mrb[40].mxu0 }
 0x599   :  { %v2068_v52 = vadd.f32 %v2067_v8, %v1987_v59  ;;  %v2069_v44 = vpop.f32.mrb[41].mxu0 }
 0x59a   :  { %v2070_v37 = vadd.f32 %v2069_v44, %v1987_v59 }
 0x59b   :  { %2155 = vst [vmem:[%s4039_s3] sm:$0xff] %v2068_v52  ;;  %v2144_v25 = vpop.f32.mrb[40].mxu1 }
 0x59c   :  { %v2145_v11 = vadd.f32 %v2144_v25, %v1987_v59  ;;  %2156 = vst [vmem:[%s4039_s3 + $0x8] sm:$0xff] %v2070_v37  ;;  %v2146_v50 = vpop.f32.mrb[41].mxu1  ;;  %v2073_v28 = vpop.f32.mrb[42].mxu0 }
 0x59d   :  { %v2147_v29 = vadd.f32 %v2146_v50, %v1987_v59  ;;  %v2074_v32 = vadd.f32 %v2073_v28, %v1992_v7  ;;  %v2075_v53 = vpop.f32.mrb[43].mxu0 }
 0x59e   :  { %2157 = vst [vmem:[%s4039_s3 + $0x10] sm:$0xff] %v2145_v11  ;;  %v2076_v60 = vadd.f32 %v2075_v53, %v1992_v7 }
 0x59f   :  { %2158 = vst [vmem:[%s4039_s3 + $0x18] sm:$0xff] %v2147_v29  ;;  %2159 = vst [vmem:[%s4039_s3 + $0x20] sm:$0xff] %v2074_v32  ;;  %v2150_v43 = vpop.f32.mrb[42].mxu1 }
 0x5a0   :  { %v2151_v49 = vadd.f32 %v2150_v43, %v1992_v7  ;;  %2160 = vst [vmem:[%s4039_s3 + $0x28] sm:$0xff] %v2076_v60  ;;  %v2152_v42 = vpop.f32.mrb[43].mxu1 }
 0x5a1   :  { %v2153_v45 = vadd.f32 %v2152_v42, %v1992_v7 }
 0x5a2   :  { %2161 = vst [vmem:[%s4039_s3 + $0x30] sm:$0xff] %v2151_v49 }
 0x5a3   :  { %2162 = vst [vmem:[%s4039_s3 + $0x38] sm:$0xff] %v2153_v45 }
 0x5a4   :  { %2167 = vsyncpa [#allocation4], 1 }

</bundles_post_ra>
